<compile_context>
chip_gen: v6e
topology: v6e:2x2x1
jax: 0.10.0
libtpu: 0.0.40
codegen_flags: <defaults>
</compile_context>

<pallas_src>
import functools
import math

import jax
import jax.numpy as jnp
from jax.experimental import pallas as pl
from jax.experimental.pallas import tpu as pltpu


# ----------------------------- kernels --------------------------------------

def _layernorm(x, gamma, beta, eps=1e-5):
    # x: (S, E), gamma/beta: (1, E).  unbiased=False variance (mean of squares).
    mean = jnp.mean(x, axis=-1, keepdims=True)
    var = jnp.mean(jnp.square(x - mean), axis=-1, keepdims=True)
    return (x - mean) * jax.lax.rsqrt(var + eps) * gamma + beta


def _attn_sublayer(x, gamma, beta, wqkv, wo, bo, causal, num_heads):
    """Pre-norm causal MHA sublayer with residual add.

    x:      (S, E)    f32
    wqkv:   (E, 3E)   bf16, columns [Q | K | V]; Q pre-scaled by 1/sqrt(hd)
    wo:     (E, E)    bf16
    bo:     (1, E)    f32
    causal: (S, S)    bool (True = future position / masked)
    """
    S, E = x.shape
    hd = E // num_heads

    xn = _layernorm(x, gamma, beta).astype(jnp.bfloat16)              # (S, E)

    # Single full-width MXU matmul for Q,K,V of all heads (no (H,S,E)
    # activation broadcast).  q/k/v splits below are 128-aligned lane slices.
    qkv = jnp.dot(xn, wqkv, preferred_element_type=jnp.float32)       # (S, 3E)

    def to_heads(y):                                  # (S, E) -> (H, S, hd)
        return jnp.stack(
            [y[:, h * hd:(h + 1) * hd] for h in range(num_heads)], axis=0
        ).astype(jnp.bfloat16)

    q = to_heads(qkv[:, :E])          # 1/sqrt(hd) already folded into Wq
    k = to_heads(qkv[:, E:2 * E])
    v = to_heads(qkv[:, 2 * E:])

    # Head-batched score matmul; 2-D mask broadcast over heads.
    sc = jnp.einsum("hqd,hkd->hqk", q, k,
                    preferred_element_type=jnp.float32)               # (H,S,S)
    sc = jnp.where(causal[None, :, :], -jnp.inf, sc)

    m = jnp.max(sc, axis=-1, keepdims=True)
    p = jnp.exp(sc - m)
    l = jnp.sum(p, axis=-1, keepdims=True)                            # (H,S,1)

    ctx = jnp.einsum("hqk,hkd->hqd", p.astype(jnp.bfloat16), v,
                     preferred_element_type=jnp.float32)              # (H,S,hd)
    # Deferred softmax denominator (EUP approx reciprocal; error << bf16
    # rounding of the matmul inputs, flagged per review).
    ctx = ctx * pl.reciprocal(l, approx=True)

    # Re-pack heads along lanes and run ONE full-depth (K = E) output matmul:
    # no (H,S,E) f32 intermediate, no cross-head VPU reduction.
    ctx_cat = jnp.concatenate([ctx[h] for h in range(num_heads)],
                              axis=-1).astype(jnp.bfloat16)           # (S, E)
    out = jnp.dot(ctx_cat, wo, preferred_element_type=jnp.float32) + bo
    return x + out                                                    # residual


def transformer_block_kernel(x_ref, g1_ref, b1_ref, g2_ref, b2_ref,
                             wqkv_ref, wo_ref, bo_ref, o_ref, *, num_heads):
    """One full TransformerBlock (both attention sublayers) per batch element.

    x_ref: (1,S,E) f32; wqkv_ref: (E,3E) bf16; wo_ref: (E,E) bf16;
    g/b/bo: (1,E) f32; o_ref: (1,S,E) f32.
    """
    x = x_ref[0]                                                      # (S, E)
    S = x.shape[0]

    # 2-D causal mask (built once, shared by both sublayers, broadcast over H).
    row = jax.lax.broadcasted_iota(jnp.int32, (S, S), 0)
    col = jax.lax.broadcasted_iota(jnp.int32, (S, S), 1)
    causal = col > row

    wqkv = wqkv_ref[...]
    wo = wo_ref[...]
    bo = bo_ref[...]

    # The reference TransformerBlock.forward applies the SAME attn module
    # twice (FeedForward/GELU are constructed but never called).
    x = _attn_sublayer(x, g1_ref[...], b1_ref[...], wqkv, wo, bo, causal, num_heads)
    x = _attn_sublayer(x, g2_ref[...], b2_ref[...], wqkv, wo, bo, causal, num_heads)
    o_ref[0] = x


def final_norm_head_kernel(x_ref, g_ref, s_ref, w_ref, o_ref, xn_ref):
    """Final LayerNorm + unembedding head tile.

    LayerNorm is computed ONCE per batch row (at vocab tile j == 0) into a
    VMEM scratch and reused for every subsequent vocab tile.
    """
    @pl.when(pl.program_id(1) == 0)
    def _():
        xn_ref[...] = _layernorm(x_ref[0], g_ref[...],
                                 s_ref[...]).astype(jnp.bfloat16)
    o_ref[0] = jnp.dot(xn_ref[...], w_ref[...],
                       preferred_element_type=jnp.float32)


# ----------------------------- wrappers -------------------------------------

def _vmem_limit_bytes():
    # Generation-aware scoped-VMEM budget (review): ~3/4 of physical VMEM
    # (128 MiB on v5e/v6e -> 96 MiB, 64 MiB/TC on v7x -> 48 MiB).  The default
    # scoped limit (16/32 MiB) is too small once S/E grow; conservative
    # fallback if the hardware query is unavailable.
    try:
        return int(pltpu.get_tpu_info().vmem_capacity_bytes * 3 // 4)
    except Exception:
        return 48 * 1024 * 1024


def transformer_block(x, g1, b1, g2, b2, wqkv2d, wo, bo, num_heads):
    B, S, E = x.shape
    vec_spec = pl.BlockSpec((1, E), lambda b: (0, 0))
    kernel = functools.partial(transformer_block_kernel, num_heads=num_heads)
    return pl.pallas_call(
        kernel,
        out_shape=jax.ShapeDtypeStruct((B, S, E), jnp.float32),
        grid=(B,),
        in_specs=[
            pl.BlockSpec((1, S, E), lambda b: (b, 0, 0)),
            vec_spec, vec_spec, vec_spec, vec_spec,        # LN1/LN2 scale+shift
            pl.BlockSpec(wqkv2d.shape, lambda b: (0, 0)),  # packed [Q|K|V]
            pl.BlockSpec(wo.shape, lambda b: (0, 0)),      # Wo
            vec_spec,                                      # bo
        ],
        out_specs=pl.BlockSpec((1, S, E), lambda b: (b, 0, 0)),
        compiler_params=pltpu.CompilerParams(
            dimension_semantics=("parallel",),
            vmem_limit_bytes=_vmem_limit_bytes()),
    )(x, g1, b1, g2, b2, wqkv2d, wo, bo)


def final_norm_head(x, gamma, beta, w_head, *, max_tile_v=2048):
    # max_tile_v: 2048 fits every generation (double-buffered (E,tv) bf16
    # weight + (S,tv) f32 output vs 64 MiB on v7x); can be raised to 4096 on
    # v5e/v6e for better HBM roofline.
    B, S, E = x.shape
    V = w_head.shape[1]
    # Lane-dense vocab tiles: pad V up to a multiple of the (128-aligned)
    # tile so stores are unmasked vst; strip the padding afterwards.
    tv = max(128, (min(max_tile_v, pl.cdiv(V, 128) * 128) // 128) * 128)
    Vp = pl.cdiv(V, tv) * tv
    if Vp != V:
        w_head = jnp.pad(w_head, ((0, 0), (0, Vp - V)))
    nv = Vp // tv
    out = pl.pallas_call(
        final_norm_head_kernel,
        out_shape=jax.ShapeDtypeStruct((B, S, Vp), jnp.float32),
        grid=(B, nv),
        in_specs=[
            pl.BlockSpec((1, S, E), lambda b, j: (b, 0, 0)),
            pl.BlockSpec((1, E), lambda b, j: (0, 0)),
            pl.BlockSpec((1, E), lambda b, j: (0, 0)),
            pl.BlockSpec((E, tv), lambda b, j: (0, j)),
        ],
        out_specs=pl.BlockSpec((1, S, tv), lambda b, j: (b, 0, j)),
        scratch_shapes=[pltpu.VMEM((S, E), jnp.bfloat16)],   # normalized x
        compiler_params=pltpu.CompilerParams(
            dimension_semantics=("parallel", "arbitrary"),
            vmem_limit_bytes=_vmem_limit_bytes()),
    )(x, gamma, beta, w_head)
    return out[..., :V] if Vp != V else out


# ----------------------------- params ----------------------------------------

def init_params(cfg, key):
    """Raw weights (for the pure-JAX reference) plus kernel-packed weights.

    Packing (concat / 1/sqrt(hd) fold / bf16 cast) happens ONCE here, not on
    the forward hot path.
    """
    V, C, E, H = (cfg["vocab_size"], cfg["context_length"],
                  cfg["emb_dim"], cfg["n_heads"])
    assert E % H == 0
    hd = E // H
    inv_scale = 1.0 / math.sqrt(hd)

    keys = jax.random.split(key, 3 + 4 * cfg["n_layers"])
    ki = iter(keys)
    std = 0.02
    rnd = lambda shape: jax.random.normal(next(ki), shape, jnp.float32) * std

    params = {
        "tok_emb": rnd((V, E)),
        "pos_emb": rnd((C, E)),
        "blocks": [],
        "final_gamma": jnp.ones((1, E), jnp.float32),
        "final_beta": jnp.zeros((1, E), jnp.float32),
        # (in, out) layout; bf16 storage for the MXU head matmul.
        "w_head": rnd((E, V)).astype(jnp.bfloat16),
    }
    for _ in range(cfg["n_layers"]):
        wq = rnd((E, E)).astype(jnp.bfloat16)
        wk = rnd((E, E)).astype(jnp.bfloat16)
        wv = rnd((E, E)).astype(jnp.bfloat16)
        wo = rnd((E, E)).astype(jnp.bfloat16)
        blk = {
            "norm1_gamma": jnp.ones((1, E), jnp.float32),
            "norm1_beta": jnp.zeros((1, E), jnp.float32),
            "norm2_gamma": jnp.ones((1, E), jnp.float32),
            "norm2_beta": jnp.zeros((1, E), jnp.float32),
            # raw weights kept only for the pure-JAX reference check
            "wq": wq, "wk": wk, "wv": wv, "wo": wo,
            "bo": jnp.zeros((1, E), jnp.float32),
            # kernel weights: columns [Q | K | V], Q pre-scaled by 1/sqrt(hd)
            "wqkv2d": jnp.concatenate(
                [wq.astype(jnp.float32) * inv_scale,
                 wk.astype(jnp.float32),
                 wv.astype(jnp.float32)], axis=1).astype(jnp.bfloat16),
            # NOTE: FeedForward/GELU weights omitted — never used in the
            # reference forward (attn is applied twice per block instead).
        }
        params["blocks"].append(blk)
    return params


# ----------------------------- model ----------------------------------------

def gpt_forward(params, in_idx, cfg):
    B, S = in_idx.shape
    # Embedding gathers are glue (plain JAX); hot path lives in Pallas kernels.
    x = params["tok_emb"][in_idx] + params["pos_emb"][:S][None, :, :]
    x = x.astype(jnp.float32)
    # drop_emb: identity (eval / drop_rate == 0)
    for blk in params["blocks"]:
        x = transformer_block(x, blk["norm1_gamma"], blk["norm1_beta"],
                              blk["norm2_gamma"], blk["norm2_beta"],
                              blk["wqkv2d"], blk["wo"], blk["bo"],
                              cfg["n_heads"])
    return final_norm_head(x, params["final_gamma"], params["final_beta"],
                           params["w_head"])


# ------------------------ pure-JAX reference (check) -------------------------

def _ref_ln(x, g, b, eps=1e-5):
    mean = jnp.mean(x, -1, keepdims=True)
    var = jnp.mean(jnp.square(x - mean), -1, keepdims=True)
    return (x - mean) / jnp.sqrt(var + eps) * g + b


def _ref_attn_sub(x, g, b, wq, wk, wv, wo, bo, H):
    B, S, E = x.shape
    hd = E // H
    xn = _ref_ln(x, g, b)
    q = (xn @ wq).reshape(B, S, H, hd).transpose(0, 2, 1, 3)
    k = (xn @ wk).reshape(B, S, H, hd).transpose(0, 2, 1, 3)
    v = (xn @ wv).reshape(B, S, H, hd).transpose(0, 2, 1, 3)
    sc = jnp.einsum("bhqd,bhkd->bhqk", q, k)
    mask = jnp.triu(jnp.ones((S, S), bool), 1)
    sc = jnp.where(mask, -jnp.inf, sc)
    w = jax.nn.softmax(sc / math.sqrt(hd), axis=-1)
    ctx = jnp.einsum("bhqk,bhkd->bhqd", w, v).transpose(0, 2, 1, 3).reshape(B, S, E)
    return x + (ctx @ wo + bo)


def gpt_forward_ref(params, in_idx, cfg):
    f32 = lambda a: a.astype(jnp.float32)
    x = params["tok_emb"][in_idx] + params["pos_emb"][:in_idx.shape[1]][None]
    for blk in params["blocks"]:
        x = _ref_attn_sub(x, blk["norm1_gamma"], blk["norm1_beta"],
                          f32(blk["wq"]), f32(blk["wk"]), f32(blk["wv"]),
                          f32(blk["wo"]), blk["bo"], cfg["n_heads"])
        x = _ref_attn_sub(x, blk["norm2_gamma"], blk["norm2_beta"],
                          f32(blk["wq"]), f32(blk["wk"]), f32(blk["wv"]),
                          f32(blk["wo"]), blk["bo"], cfg["n_heads"])
    x = _ref_ln(x, params["final_gamma"], params["final_beta"])
    return x @ f32(params["w_head"])


# ----------------------------- main ------------------------------------------

if __name__ == "__main__":
    # emb_dim / vocab are multiples of 128 so every block is lane-dense.
    cfg = dict(vocab_size=256, context_length=16, emb_dim=128,
               n_heads=4, n_layers=2, drop_rate=0.0, qkv_bias=False)

    key = jax.random.PRNGKey(0)
    k_param, k_idx = jax.random.split(key)
    params = init_params(cfg, k_param)

    B, S = 2, 8
    in_idx = jax.random.randint(k_idx, (B, S), 0, cfg["vocab_size"], jnp.int32)

    logits = jax.block_until_ready(gpt_forward(params, in_idx, cfg))
    assert logits.shape == (B, S, cfg["vocab_size"])
    assert logits.dtype == jnp.float32

    ref = jax.block_until_ready(gpt_forward_ref(params, in_idx, cfg))
    assert jnp.allclose(logits, ref, atol=2e-2, rtol=2e-2), \
        float(jnp.max(jnp.abs(logits - ref)))

    print("KERNEL_OK")
</pallas_src>

<mosaic_0001>
module attributes {stable_mosaic.version = 11 : i64} {
  func.func @transformer_block_kernel(%arg0: i32, %arg1: memref<1x8x128xf32, #tpu.memory_space<vmem>>, %arg2: memref<1x128xf32, #tpu.memory_space<vmem>>, %arg3: memref<1x128xf32, #tpu.memory_space<vmem>>, %arg4: memref<1x128xf32, #tpu.memory_space<vmem>>, %arg5: memref<1x128xf32, #tpu.memory_space<vmem>>, %arg6: memref<128x384xbf16, #tpu.memory_space<vmem>>, %arg7: memref<128x128xbf16, #tpu.memory_space<vmem>>, %arg8: memref<1x128xf32, #tpu.memory_space<vmem>>, %arg9: memref<1x8x128xf32, #tpu.memory_space<vmem>>) attributes {dimension_semantics = [#tpu.dimension_semantics<parallel>], iteration_bounds = array<i64: 2>, scalar_prefetch = 0 : i64, scratch_operands = 0 : i64, tpu.core_type = #tpu.core_type<tc>, window_params = [{transform_indices = @transform_0, window_bounds = array<i64: 1, 8, 128>}, {pipeline_mode = #tpu.pipeline_mode<synchronous>, transform_indices = @transform_1, window_bounds = array<i64: 1, 128>}, {pipeline_mode = #tpu.pipeline_mode<synchronous>, transform_indices = @transform_2, window_bounds = array<i64: 1, 128>}, {pipeline_mode = #tpu.pipeline_mode<synchronous>, transform_indices = @transform_3, window_bounds = array<i64: 1, 128>}, {pipeline_mode = #tpu.pipeline_mode<synchronous>, transform_indices = @transform_4, window_bounds = array<i64: 1, 128>}, {pipeline_mode = #tpu.pipeline_mode<synchronous>, transform_indices = @transform_5, window_bounds = array<i64: 128, 384>}, {pipeline_mode = #tpu.pipeline_mode<synchronous>, transform_indices = @transform_6, window_bounds = array<i64: 128, 128>}, {pipeline_mode = #tpu.pipeline_mode<synchronous>, transform_indices = @transform_7, window_bounds = array<i64: 1, 128>}, {transform_indices = @transform_8, window_bounds = array<i64: 1, 8, 128>}]} {
    %c0 = arith.constant 0 : index
    %c0_0 = arith.constant 0 : index
    %c0_1 = arith.constant 0 : index
    %0 = vector.load %arg1[%c0, %c0_0, %c0_1] : memref<1x8x128xf32, #tpu.memory_space<vmem>>, vector<1x8x128xf32>
    %1 = vector.shape_cast %0 : vector<1x8x128xf32> to vector<8x128xf32>
    %2 = tpu.iota {dimensions = array<i32: 0>} : vector<8x8xi32>
    %3 = tpu.iota {dimensions = array<i32: 1>} : vector<8x8xi32>
    %4 = arith.cmpi sgt, %3, %2 : vector<8x8xi32>
    %c0_2 = arith.constant 0 : index
    %c0_3 = arith.constant 0 : index
    %5 = vector.load %arg6[%c0_2, %c0_3] : memref<128x384xbf16, #tpu.memory_space<vmem>>, vector<128x384xbf16>
    %c0_4 = arith.constant 0 : index
    %c0_5 = arith.constant 0 : index
    %6 = vector.load %arg7[%c0_4, %c0_5] : memref<128x128xbf16, #tpu.memory_space<vmem>>, vector<128x128xbf16>
    %c0_6 = arith.constant 0 : index
    %c0_7 = arith.constant 0 : index
    %7 = vector.load %arg8[%c0_6, %c0_7] : memref<1x128xf32, #tpu.memory_space<vmem>>, vector<1x128xf32>
    %c0_8 = arith.constant 0 : index
    %c0_9 = arith.constant 0 : index
    %8 = vector.load %arg2[%c0_8, %c0_9] : memref<1x128xf32, #tpu.memory_space<vmem>>, vector<1x128xf32>
    %c0_10 = arith.constant 0 : index
    %c0_11 = arith.constant 0 : index
    %9 = vector.load %arg3[%c0_10, %c0_11] : memref<1x128xf32, #tpu.memory_space<vmem>>, vector<1x128xf32>
    %cst = arith.constant dense<0.000000e+00> : vector<8xf32>
    %10 = vector.multi_reduction <add>, %1, %cst [1] : vector<8x128xf32> to vector<8xf32>
    %11 = vector.shape_cast %10 : vector<8xf32> to vector<8x1xf32>
    %cst_12 = arith.constant 1.280000e+02 : f32
    %12 = vector.broadcast %cst_12 : f32 to vector<8x1xf32>
    %13 = arith.divf %11, %12 : vector<8x1xf32>
    %14 = vector.broadcast %13 : vector<8x1xf32> to vector<8x128xf32>
    %15 = arith.subf %1, %14 : vector<8x128xf32>
    %16 = arith.mulf %15, %15 : vector<8x128xf32>
    %cst_13 = arith.constant dense<0.000000e+00> : vector<8xf32>
    %17 = vector.multi_reduction <add>, %16, %cst_13 [1] : vector<8x128xf32> to vector<8xf32>
    %18 = vector.shape_cast %17 : vector<8xf32> to vector<8x1xf32>
    %cst_14 = arith.constant 1.280000e+02 : f32
    %19 = vector.broadcast %cst_14 : f32 to vector<8x1xf32>
    %20 = arith.divf %18, %19 : vector<8x1xf32>
    %21 = vector.broadcast %13 : vector<8x1xf32> to vector<8x128xf32>
    %22 = arith.subf %1, %21 : vector<8x128xf32>
    %cst_15 = arith.constant 9.99999974E-6 : f32
    %23 = vector.broadcast %cst_15 : f32 to vector<8x1xf32>
    %24 = arith.addf %20, %23 : vector<8x1xf32>
    %25 = math.rsqrt %24 : vector<8x1xf32>
    %26 = vector.broadcast %25 : vector<8x1xf32> to vector<8x128xf32>
    %27 = arith.mulf %22, %26 : vector<8x128xf32>
    %28 = vector.broadcast %8 : vector<1x128xf32> to vector<8x128xf32>
    %29 = arith.mulf %27, %28 : vector<8x128xf32>
    %30 = vector.broadcast %9 : vector<1x128xf32> to vector<8x128xf32>
    %31 = arith.addf %29, %30 : vector<8x128xf32>
    %32 = arith.truncf %31 : vector<8x128xf32> to vector<8x128xbf16>
    %cst_16 = arith.constant dense<0.000000e+00> : vector<8x384xf32>
    %33 = tpu.matmul %32, %5, %cst_16 {dimension_numbers = #tpu.dot_dimension_numbers<[1], [0], [0], [1], [0, 0, 1, 1], [], []>} : vector<8x128xbf16>, vector<128x384xbf16>, vector<8x384xf32> -> vector<8x384xf32>
    %34 = vector.extract_strided_slice %33 {offsets = [0, 0], sizes = [8, 128], strides = [1, 1]} : vector<8x384xf32> to vector<8x128xf32>
    %35 = vector.extract_strided_slice %34 {offsets = [0, 0], sizes = [8, 32], strides = [1, 1]} : vector<8x128xf32> to vector<8x32xf32>
    %36 = vector.extract_strided_slice %34 {offsets = [0, 32], sizes = [8, 32], strides = [1, 1]} : vector<8x128xf32> to vector<8x32xf32>
    %37 = vector.extract_strided_slice %34 {offsets = [0, 64], sizes = [8, 32], strides = [1, 1]} : vector<8x128xf32> to vector<8x32xf32>
    %38 = vector.extract_strided_slice %34 {offsets = [0, 96], sizes = [8, 32], strides = [1, 1]} : vector<8x128xf32> to vector<8x32xf32>
    %39 = vector.shape_cast %35 : vector<8x32xf32> to vector<1x8x32xf32>
    %40 = vector.shape_cast %36 : vector<8x32xf32> to vector<1x8x32xf32>
    %41 = vector.shape_cast %37 : vector<8x32xf32> to vector<1x8x32xf32>
    %42 = vector.shape_cast %38 : vector<8x32xf32> to vector<1x8x32xf32>
    %43 = tpu.concatenate %39, %40, %41, %42 in 0 : vector<1x8x32xf32>, vector<1x8x32xf32>, vector<1x8x32xf32>, vector<1x8x32xf32> -> vector<4x8x32xf32>
    %44 = arith.truncf %43 : vector<4x8x32xf32> to vector<4x8x32xbf16>
    %45 = vector.extract_strided_slice %33 {offsets = [0, 128], sizes = [8, 128], strides = [1, 1]} : vector<8x384xf32> to vector<8x128xf32>
    %46 = vector.extract_strided_slice %45 {offsets = [0, 0], sizes = [8, 32], strides = [1, 1]} : vector<8x128xf32> to vector<8x32xf32>
    %47 = vector.extract_strided_slice %45 {offsets = [0, 32], sizes = [8, 32], strides = [1, 1]} : vector<8x128xf32> to vector<8x32xf32>
    %48 = vector.extract_strided_slice %45 {offsets = [0, 64], sizes = [8, 32], strides = [1, 1]} : vector<8x128xf32> to vector<8x32xf32>
    %49 = vector.extract_strided_slice %45 {offsets = [0, 96], sizes = [8, 32], strides = [1, 1]} : vector<8x128xf32> to vector<8x32xf32>
    %50 = vector.shape_cast %46 : vector<8x32xf32> to vector<1x8x32xf32>
    %51 = vector.shape_cast %47 : vector<8x32xf32> to vector<1x8x32xf32>
    %52 = vector.shape_cast %48 : vector<8x32xf32> to vector<1x8x32xf32>
    %53 = vector.shape_cast %49 : vector<8x32xf32> to vector<1x8x32xf32>
    %54 = tpu.concatenate %50, %51, %52, %53 in 0 : vector<1x8x32xf32>, vector<1x8x32xf32>, vector<1x8x32xf32>, vector<1x8x32xf32> -> vector<4x8x32xf32>
    %55 = arith.truncf %54 : vector<4x8x32xf32> to vector<4x8x32xbf16>
    %56 = vector.extract_strided_slice %33 {offsets = [0, 256], sizes = [8, 128], strides = [1, 1]} : vector<8x384xf32> to vector<8x128xf32>
    %57 = vector.extract_strided_slice %56 {offsets = [0, 0], sizes = [8, 32], strides = [1, 1]} : vector<8x128xf32> to vector<8x32xf32>
    %58 = vector.extract_strided_slice %56 {offsets = [0, 32], sizes = [8, 32], strides = [1, 1]} : vector<8x128xf32> to vector<8x32xf32>
    %59 = vector.extract_strided_slice %56 {offsets = [0, 64], sizes = [8, 32], strides = [1, 1]} : vector<8x128xf32> to vector<8x32xf32>
    %60 = vector.extract_strided_slice %56 {offsets = [0, 96], sizes = [8, 32], strides = [1, 1]} : vector<8x128xf32> to vector<8x32xf32>
    %61 = vector.shape_cast %57 : vector<8x32xf32> to vector<1x8x32xf32>
    %62 = vector.shape_cast %58 : vector<8x32xf32> to vector<1x8x32xf32>
    %63 = vector.shape_cast %59 : vector<8x32xf32> to vector<1x8x32xf32>
    %64 = vector.shape_cast %60 : vector<8x32xf32> to vector<1x8x32xf32>
    %65 = tpu.concatenate %61, %62, %63, %64 in 0 : vector<1x8x32xf32>, vector<1x8x32xf32>, vector<1x8x32xf32>, vector<1x8x32xf32> -> vector<4x8x32xf32>
    %66 = arith.truncf %65 : vector<4x8x32xf32> to vector<4x8x32xbf16>
    "tpu.trace_start"() <{level = 10 : i32, message = "hqd,hkd->hqk"}> : () -> ()
    %cst_17 = arith.constant dense<0.000000e+00> : vector<4x8x8xf32>
    %67 = tpu.matmul %44, %55, %cst_17 {dimension_numbers = #tpu.dot_dimension_numbers<[2], [2], [1], [1], [0, 0, 0, 1, 1, 1], [0], [0]>} : vector<4x8x32xbf16>, vector<4x8x32xbf16>, vector<4x8x8xf32> -> vector<4x8x8xf32>
    "tpu.trace_stop"() : () -> ()
    %68 = vector.shape_cast %4 : vector<8x8xi1> to vector<1x8x8xi1>
    %cst_18 = arith.constant 0xFF800000 : f32
    %69 = vector.shape_cast %68 : vector<1x8x8xi1> to vector<1x8x8xi1>
    %70 = vector.broadcast %69 : vector<1x8x8xi1> to vector<4x8x8xi1>
    %71 = vector.broadcast %cst_18 : f32 to vector<4x8x8xf32>
    %72 = arith.select %70, %71, %67 : vector<4x8x8xi1>, vector<4x8x8xf32>
    %cst_19 = arith.constant dense<0xFF800000> : vector<4x8xf32>
    %73 = vector.multi_reduction <maximumf>, %72, %cst_19 [2] : vector<4x8x8xf32> to vector<4x8xf32>
    %74 = vector.shape_cast %73 : vector<4x8xf32> to vector<4x8x1xf32>
    %75 = vector.broadcast %74 : vector<4x8x1xf32> to vector<4x8x8xf32>
    %76 = arith.subf %72, %75 : vector<4x8x8xf32>
    %77 = math.exp %76 : vector<4x8x8xf32>
    %cst_20 = arith.constant dense<0.000000e+00> : vector<4x8xf32>
    %78 = vector.multi_reduction <add>, %77, %cst_20 [2] : vector<4x8x8xf32> to vector<4x8xf32>
    %79 = vector.shape_cast %78 : vector<4x8xf32> to vector<4x8x1xf32>
    %80 = arith.truncf %77 : vector<4x8x8xf32> to vector<4x8x8xbf16>
    "tpu.trace_start"() <{level = 10 : i32, message = "hqk,hkd->hqd"}> : () -> ()
    %cst_21 = arith.constant dense<0.000000e+00> : vector<4x8x32xf32>
    %81 = tpu.matmul %80, %66, %cst_21 {dimension_numbers = #tpu.dot_dimension_numbers<[2], [1], [1], [2], [0, 0, 0, 1, 1, 2], [0], [0]>} : vector<4x8x8xbf16>, vector<4x8x32xbf16>, vector<4x8x32xf32> -> vector<4x8x32xf32>
    "tpu.trace_stop"() : () -> ()
    %82 = tpu.reciprocal %79 {approx = true} : vector<4x8x1xf32> -> vector<4x8x1xf32>
    %83 = vector.broadcast %82 : vector<4x8x1xf32> to vector<4x8x32xf32>
    %84 = arith.mulf %81, %83 : vector<4x8x32xf32>
    %85 = vector.extract_strided_slice %84 {offsets = [0, 0, 0], sizes = [1, 8, 32], strides = [1, 1, 1]} : vector<4x8x32xf32> to vector<1x8x32xf32>
    %86 = vector.shape_cast %85 : vector<1x8x32xf32> to vector<8x32xf32>
    %87 = vector.extract_strided_slice %84 {offsets = [1, 0, 0], sizes = [1, 8, 32], strides = [1, 1, 1]} : vector<4x8x32xf32> to vector<1x8x32xf32>
    %88 = vector.shape_cast %87 : vector<1x8x32xf32> to vector<8x32xf32>
    %89 = vector.extract_strided_slice %84 {offsets = [2, 0, 0], sizes = [1, 8, 32], strides = [1, 1, 1]} : vector<4x8x32xf32> to vector<1x8x32xf32>
    %90 = vector.shape_cast %89 : vector<1x8x32xf32> to vector<8x32xf32>
    %91 = vector.extract_strided_slice %84 {offsets = [3, 0, 0], sizes = [1, 8, 32], strides = [1, 1, 1]} : vector<4x8x32xf32> to vector<1x8x32xf32>
    %92 = vector.shape_cast %91 : vector<1x8x32xf32> to vector<8x32xf32>
    %93 = tpu.concatenate %86, %88, %90, %92 in 1 : vector<8x32xf32>, vector<8x32xf32>, vector<8x32xf32>, vector<8x32xf32> -> vector<8x128xf32>
    %94 = arith.truncf %93 : vector<8x128xf32> to vector<8x128xbf16>
    %cst_22 = arith.constant dense<0.000000e+00> : vector<8x128xf32>
    %95 = tpu.matmul %94, %6, %cst_22 {dimension_numbers = #tpu.dot_dimension_numbers<[1], [0], [0], [1], [0, 0, 1, 1], [], []>} : vector<8x128xbf16>, vector<128x128xbf16>, vector<8x128xf32> -> vector<8x128xf32>
    %96 = vector.broadcast %7 : vector<1x128xf32> to vector<8x128xf32>
    %97 = arith.addf %95, %96 : vector<8x128xf32>
    %98 = arith.addf %1, %97 : vector<8x128xf32>
    %c0_23 = arith.constant 0 : index
    %c0_24 = arith.constant 0 : index
    %99 = vector.load %arg4[%c0_23, %c0_24] : memref<1x128xf32, #tpu.memory_space<vmem>>, vector<1x128xf32>
    %c0_25 = arith.constant 0 : index
    %c0_26 = arith.constant 0 : index
    %100 = vector.load %arg5[%c0_25, %c0_26] : memref<1x128xf32, #tpu.memory_space<vmem>>, vector<1x128xf32>
    %cst_27 = arith.constant dense<0.000000e+00> : vector<8xf32>
    %101 = vector.multi_reduction <add>, %98, %cst_27 [1] : vector<8x128xf32> to vector<8xf32>
    %102 = vector.shape_cast %101 : vector<8xf32> to vector<8x1xf32>
    %cst_28 = arith.constant 1.280000e+02 : f32
    %103 = vector.broadcast %cst_28 : f32 to vector<8x1xf32>
    %104 = arith.divf %102, %103 : vector<8x1xf32>
    %105 = vector.broadcast %104 : vector<8x1xf32> to vector<8x128xf32>
    %106 = arith.subf %98, %105 : vector<8x128xf32>
    %107 = arith.mulf %106, %106 : vector<8x128xf32>
    %cst_29 = arith.constant dense<0.000000e+00> : vector<8xf32>
    %108 = vector.multi_reduction <add>, %107, %cst_29 [1] : vector<8x128xf32> to vector<8xf32>
    %109 = vector.shape_cast %108 : vector<8xf32> to vector<8x1xf32>
    %cst_30 = arith.constant 1.280000e+02 : f32
    %110 = vector.broadcast %cst_30 : f32 to vector<8x1xf32>
    %111 = arith.divf %109, %110 : vector<8x1xf32>
    %112 = vector.broadcast %104 : vector<8x1xf32> to vector<8x128xf32>
    %113 = arith.subf %98, %112 : vector<8x128xf32>
    %cst_31 = arith.constant 9.99999974E-6 : f32
    %114 = vector.broadcast %cst_31 : f32 to vector<8x1xf32>
    %115 = arith.addf %111, %114 : vector<8x1xf32>
    %116 = math.rsqrt %115 : vector<8x1xf32>
    %117 = vector.broadcast %116 : vector<8x1xf32> to vector<8x128xf32>
    %118 = arith.mulf %113, %117 : vector<8x128xf32>
    %119 = vector.broadcast %99 : vector<1x128xf32> to vector<8x128xf32>
    %120 = arith.mulf %118, %119 : vector<8x128xf32>
    %121 = vector.broadcast %100 : vector<1x128xf32> to vector<8x128xf32>
    %122 = arith.addf %120, %121 : vector<8x128xf32>
    %123 = arith.truncf %122 : vector<8x128xf32> to vector<8x128xbf16>
    %cst_32 = arith.constant dense<0.000000e+00> : vector<8x384xf32>
    %124 = tpu.matmul %123, %5, %cst_32 {dimension_numbers = #tpu.dot_dimension_numbers<[1], [0], [0], [1], [0, 0, 1, 1], [], []>} : vector<8x128xbf16>, vector<128x384xbf16>, vector<8x384xf32> -> vector<8x384xf32>
    %125 = vector.extract_strided_slice %124 {offsets = [0, 0], sizes = [8, 128], strides = [1, 1]} : vector<8x384xf32> to vector<8x128xf32>
    %126 = vector.extract_strided_slice %125 {offsets = [0, 0], sizes = [8, 32], strides = [1, 1]} : vector<8x128xf32> to vector<8x32xf32>
    %127 = vector.extract_strided_slice %125 {offsets = [0, 32], sizes = [8, 32], strides = [1, 1]} : vector<8x128xf32> to vector<8x32xf32>
    %128 = vector.extract_strided_slice %125 {offsets = [0, 64], sizes = [8, 32], strides = [1, 1]} : vector<8x128xf32> to vector<8x32xf32>
    %129 = vector.extract_strided_slice %125 {offsets = [0, 96], sizes = [8, 32], strides = [1, 1]} : vector<8x128xf32> to vector<8x32xf32>
    %130 = vector.shape_cast %126 : vector<8x32xf32> to vector<1x8x32xf32>
    %131 = vector.shape_cast %127 : vector<8x32xf32> to vector<1x8x32xf32>
    %132 = vector.shape_cast %128 : vector<8x32xf32> to vector<1x8x32xf32>
    %133 = vector.shape_cast %129 : vector<8x32xf32> to vector<1x8x32xf32>
    %134 = tpu.concatenate %130, %131, %132, %133 in 0 : vector<1x8x32xf32>, vector<1x8x32xf32>, vector<1x8x32xf32>, vector<1x8x32xf32> -> vector<4x8x32xf32>
    %135 = arith.truncf %134 : vector<4x8x32xf32> to vector<4x8x32xbf16>
    %136 = vector.extract_strided_slice %124 {offsets = [0, 128], sizes = [8, 128], strides = [1, 1]} : vector<8x384xf32> to vector<8x128xf32>
    %137 = vector.extract_strided_slice %136 {offsets = [0, 0], sizes = [8, 32], strides = [1, 1]} : vector<8x128xf32> to vector<8x32xf32>
    %138 = vector.extract_strided_slice %136 {offsets = [0, 32], sizes = [8, 32], strides = [1, 1]} : vector<8x128xf32> to vector<8x32xf32>
    %139 = vector.extract_strided_slice %136 {offsets = [0, 64], sizes = [8, 32], strides = [1, 1]} : vector<8x128xf32> to vector<8x32xf32>
    %140 = vector.extract_strided_slice %136 {offsets = [0, 96], sizes = [8, 32], strides = [1, 1]} : vector<8x128xf32> to vector<8x32xf32>
    %141 = vector.shape_cast %137 : vector<8x32xf32> to vector<1x8x32xf32>
    %142 = vector.shape_cast %138 : vector<8x32xf32> to vector<1x8x32xf32>
    %143 = vector.shape_cast %139 : vector<8x32xf32> to vector<1x8x32xf32>
    %144 = vector.shape_cast %140 : vector<8x32xf32> to vector<1x8x32xf32>
    %145 = tpu.concatenate %141, %142, %143, %144 in 0 : vector<1x8x32xf32>, vector<1x8x32xf32>, vector<1x8x32xf32>, vector<1x8x32xf32> -> vector<4x8x32xf32>
    %146 = arith.truncf %145 : vector<4x8x32xf32> to vector<4x8x32xbf16>
    %147 = vector.extract_strided_slice %124 {offsets = [0, 256], sizes = [8, 128], strides = [1, 1]} : vector<8x384xf32> to vector<8x128xf32>
    %148 = vector.extract_strided_slice %147 {offsets = [0, 0], sizes = [8, 32], strides = [1, 1]} : vector<8x128xf32> to vector<8x32xf32>
    %149 = vector.extract_strided_slice %147 {offsets = [0, 32], sizes = [8, 32], strides = [1, 1]} : vector<8x128xf32> to vector<8x32xf32>
    %150 = vector.extract_strided_slice %147 {offsets = [0, 64], sizes = [8, 32], strides = [1, 1]} : vector<8x128xf32> to vector<8x32xf32>
    %151 = vector.extract_strided_slice %147 {offsets = [0, 96], sizes = [8, 32], strides = [1, 1]} : vector<8x128xf32> to vector<8x32xf32>
    %152 = vector.shape_cast %148 : vector<8x32xf32> to vector<1x8x32xf32>
    %153 = vector.shape_cast %149 : vector<8x32xf32> to vector<1x8x32xf32>
    %154 = vector.shape_cast %150 : vector<8x32xf32> to vector<1x8x32xf32>
    %155 = vector.shape_cast %151 : vector<8x32xf32> to vector<1x8x32xf32>
    %156 = tpu.concatenate %152, %153, %154, %155 in 0 : vector<1x8x32xf32>, vector<1x8x32xf32>, vector<1x8x32xf32>, vector<1x8x32xf32> -> vector<4x8x32xf32>
    %157 = arith.truncf %156 : vector<4x8x32xf32> to vector<4x8x32xbf16>
    "tpu.trace_start"() <{level = 10 : i32, message = "hqd,hkd->hqk"}> : () -> ()
    %cst_33 = arith.constant dense<0.000000e+00> : vector<4x8x8xf32>
    %158 = tpu.matmul %135, %146, %cst_33 {dimension_numbers = #tpu.dot_dimension_numbers<[2], [2], [1], [1], [0, 0, 0, 1, 1, 1], [0], [0]>} : vector<4x8x32xbf16>, vector<4x8x32xbf16>, vector<4x8x8xf32> -> vector<4x8x8xf32>
    "tpu.trace_stop"() : () -> ()
    %159 = vector.shape_cast %4 : vector<8x8xi1> to vector<1x8x8xi1>
    %cst_34 = arith.constant 0xFF800000 : f32
    %160 = vector.shape_cast %159 : vector<1x8x8xi1> to vector<1x8x8xi1>
    %161 = vector.broadcast %160 : vector<1x8x8xi1> to vector<4x8x8xi1>
    %162 = vector.broadcast %cst_34 : f32 to vector<4x8x8xf32>
    %163 = arith.select %161, %162, %158 : vector<4x8x8xi1>, vector<4x8x8xf32>
    %cst_35 = arith.constant dense<0xFF800000> : vector<4x8xf32>
    %164 = vector.multi_reduction <maximumf>, %163, %cst_35 [2] : vector<4x8x8xf32> to vector<4x8xf32>
    %165 = vector.shape_cast %164 : vector<4x8xf32> to vector<4x8x1xf32>
    %166 = vector.broadcast %165 : vector<4x8x1xf32> to vector<4x8x8xf32>
    %167 = arith.subf %163, %166 : vector<4x8x8xf32>
    %168 = math.exp %167 : vector<4x8x8xf32>
    %cst_36 = arith.constant dense<0.000000e+00> : vector<4x8xf32>
    %169 = vector.multi_reduction <add>, %168, %cst_36 [2] : vector<4x8x8xf32> to vector<4x8xf32>
    %170 = vector.shape_cast %169 : vector<4x8xf32> to vector<4x8x1xf32>
    %171 = arith.truncf %168 : vector<4x8x8xf32> to vector<4x8x8xbf16>
    "tpu.trace_start"() <{level = 10 : i32, message = "hqk,hkd->hqd"}> : () -> ()
    %cst_37 = arith.constant dense<0.000000e+00> : vector<4x8x32xf32>
    %172 = tpu.matmul %171, %157, %cst_37 {dimension_numbers = #tpu.dot_dimension_numbers<[2], [1], [1], [2], [0, 0, 0, 1, 1, 2], [0], [0]>} : vector<4x8x8xbf16>, vector<4x8x32xbf16>, vector<4x8x32xf32> -> vector<4x8x32xf32>
    "tpu.trace_stop"() : () -> ()
    %173 = tpu.reciprocal %170 {approx = true} : vector<4x8x1xf32> -> vector<4x8x1xf32>
    %174 = vector.broadcast %173 : vector<4x8x1xf32> to vector<4x8x32xf32>
    %175 = arith.mulf %172, %174 : vector<4x8x32xf32>
    %176 = vector.extract_strided_slice %175 {offsets = [0, 0, 0], sizes = [1, 8, 32], strides = [1, 1, 1]} : vector<4x8x32xf32> to vector<1x8x32xf32>
    %177 = vector.shape_cast %176 : vector<1x8x32xf32> to vector<8x32xf32>
    %178 = vector.extract_strided_slice %175 {offsets = [1, 0, 0], sizes = [1, 8, 32], strides = [1, 1, 1]} : vector<4x8x32xf32> to vector<1x8x32xf32>
    %179 = vector.shape_cast %178 : vector<1x8x32xf32> to vector<8x32xf32>
    %180 = vector.extract_strided_slice %175 {offsets = [2, 0, 0], sizes = [1, 8, 32], strides = [1, 1, 1]} : vector<4x8x32xf32> to vector<1x8x32xf32>
    %181 = vector.shape_cast %180 : vector<1x8x32xf32> to vector<8x32xf32>
    %182 = vector.extract_strided_slice %175 {offsets = [3, 0, 0], sizes = [1, 8, 32], strides = [1, 1, 1]} : vector<4x8x32xf32> to vector<1x8x32xf32>
    %183 = vector.shape_cast %182 : vector<1x8x32xf32> to vector<8x32xf32>
    %184 = tpu.concatenate %177, %179, %181, %183 in 1 : vector<8x32xf32>, vector<8x32xf32>, vector<8x32xf32>, vector<8x32xf32> -> vector<8x128xf32>
    %185 = arith.truncf %184 : vector<8x128xf32> to vector<8x128xbf16>
    %cst_38 = arith.constant dense<0.000000e+00> : vector<8x128xf32>
    %186 = tpu.matmul %185, %6, %cst_38 {dimension_numbers = #tpu.dot_dimension_numbers<[1], [0], [0], [1], [0, 0, 1, 1], [], []>} : vector<8x128xbf16>, vector<128x128xbf16>, vector<8x128xf32> -> vector<8x128xf32>
    %187 = vector.broadcast %7 : vector<1x128xf32> to vector<8x128xf32>
    %188 = arith.addf %186, %187 : vector<8x128xf32>
    %189 = arith.addf %98, %188 : vector<8x128xf32>
    %c0_39 = arith.constant 0 : index
    %c0_40 = arith.constant 0 : index
    %c0_41 = arith.constant 0 : index
    %190 = vector.load %arg9[%c0_39, %c0_40, %c0_41] : memref<1x8x128xf32, #tpu.memory_space<vmem>>, vector<1x8x128xf32>
    %191 = vector.shape_cast %190 : vector<1x8x128xf32> to vector<8x128xf32>
    %192 = vector.shape_cast %189 : vector<8x128xf32> to vector<1x8x128xf32>
    tpu.vector_store %arg9[%c0_39, %c0_40, %c0_41], %192 {strides = array<i32>} : memref<1x8x128xf32, #tpu.memory_space<vmem>>, vector<1x8x128xf32>,
    return
  }
  func.func @transform_0(%arg0: i32) -> (i32, i32, i32) {
    %c0_i32 = arith.constant 0 : i32
    %c0_i32_0 = arith.constant 0 : i32
    %c0_i32_1 = arith.constant 0 : i32
    return %arg0, %c0_i32, %c0_i32_0 : i32, i32, i32
  }
  func.func @transform_1(%arg0: i32) -> (i32, i32) {
    %c0_i32 = arith.constant 0 : i32
    %c0_i32_0 = arith.constant 0 : i32
    %c0_i32_1 = arith.constant 0 : i32
    return %c0_i32, %c0_i32_0 : i32, i32
  }
  func.func @transform_2(%arg0: i32) -> (i32, i32) {
    %c0_i32 = arith.constant 0 : i32
    %c0_i32_0 = arith.constant 0 : i32
    %c0_i32_1 = arith.constant 0 : i32
    return %c0_i32, %c0_i32_0 : i32, i32
  }
  func.func @transform_3(%arg0: i32) -> (i32, i32) {
    %c0_i32 = arith.constant 0 : i32
    %c0_i32_0 = arith.constant 0 : i32
    %c0_i32_1 = arith.constant 0 : i32
    return %c0_i32, %c0_i32_0 : i32, i32
  }
  func.func @transform_4(%arg0: i32) -> (i32, i32) {
    %c0_i32 = arith.constant 0 : i32
    %c0_i32_0 = arith.constant 0 : i32
    %c0_i32_1 = arith.constant 0 : i32
    return %c0_i32, %c0_i32_0 : i32, i32
  }
  func.func @transform_5(%arg0: i32) -> (i32, i32) {
    %c0_i32 = arith.constant 0 : i32
    %c0_i32_0 = arith.constant 0 : i32
    %c0_i32_1 = arith.constant 0 : i32
    return %c0_i32, %c0_i32_0 : i32, i32
  }
  func.func @transform_6(%arg0: i32) -> (i32, i32) {
    %c0_i32 = arith.constant 0 : i32
    %c0_i32_0 = arith.constant 0 : i32
    %c0_i32_1 = arith.constant 0 : i32
    return %c0_i32, %c0_i32_0 : i32, i32
  }
  func.func @transform_7(%arg0: i32) -> (i32, i32) {
    %c0_i32 = arith.constant 0 : i32
    %c0_i32_0 = arith.constant 0 : i32
    %c0_i32_1 = arith.constant 0 : i32
    return %c0_i32, %c0_i32_0 : i32, i32
  }
  func.func @transform_8(%arg0: i32) -> (i32, i32, i32) {
    %c0_i32 = arith.constant 0 : i32
    %c0_i32_0 = arith.constant 0 : i32
    %c0_i32_1 = arith.constant 0 : i32
    return %arg0, %c0_i32, %c0_i32_0 : i32, i32, i32
  }
}

</mosaic_0001>

<bundles_post_ra>
// kernel: tpu_custom_call.1
= control target key start
LH: loop header
LB: loop body
LE: loop exit
PB: predicated region body
PF: predicated region fallthrough
CT: control target
= control target key end

     0   :  { %s3171_s0 = inlined_call_operand.hbm [shape: f32[2,8,128], index: 0, kind: input, shape index: {}]   ;;  %s3172_s1 = inlined_call_operand.vmem [shape: f32[1,128], index: 1, kind: input, shape index: {}]   ;;  %s3173_s2 = inlined_call_operand.vmem [shape: f32[1,128], index: 2, kind: input, shape index: {}]   ;;  %s3174_s3 = inlined_call_operand.vmem [shape: f32[1,128], index: 3, kind: input, shape index: {}]   ;;  %s3175_s4 = inlined_call_operand.vmem [shape: f32[1,128], index: 4, kind: input, shape index: {}]   ;;  %s3176_s5 = inlined_call_operand.hbm [shape: bf16[128,384], index: 5, kind: input, shape index: {}]   ;;  %s3177_s6 = inlined_call_operand.hbm [shape: bf16[128,128], index: 6, kind: input, shape index: {}]   ;;  %s3178_s7 = inlined_call_operand.vmem [shape: f32[1,128], index: 7, kind: input, shape index: {}]   ;;  %s3179_s8 = inlined_call_operand.hbm [shape: f32[2,8,128], index: 8, kind: output, shape index: {}]  }
   0x1   :  { %3184 = sst [smem:[#allocation13_spill]] %s3176_s5 }
   0x2   :  { %3185 = sst [smem:[#allocation14_spill]] %s3177_s6 }
   0x3   :  { %13 = vsyncpa [#allocation3], 0 }
   0x4   :  { %15 = vsyncpa [#allocation3 + $0x1], 0 }
   0x5   :  { %16 = vsyncpa [#allocation6], 0 }
   0x6   :  { %17 = vsyncpa [#allocation4], 0 }
   0x7   :  { %19 = vsyncpa [#allocation4 + $0x1], 0  ;;  %s2631_s27 = smov 0   ;;  %s2633_s28 = smov 0  }
   0x8   :  { %s2635_s29 = smov 0   ;;  %s2637_s30 = smov 0  }
   0x9 LB: > { %s2652_s9 = sadd.s32 4294967295, %s2570_s30   ;;  %s1956_s10 = sadd.s32 4294967294, %s2570_s30   ;;  %s2570_s30 = sphi %s2637_s30, %s3209_s30   ;;  %s2566_s29 = sphi %s2635_s29, %s3208_s29   ;;  %s2562_s28 = sphi %s2633_s28, %s3207_s28   ;;  %s2558_s27 = sphi %s2631_s27, %s3206_s27  }
   0xa   : > { %p45_p0 = scmp.ne.s32.totalorder %s2562_s28, %s2558_s27  ;;  %p3180_p1 = scmp.eq.s32.totalorder %s2652_s9, 0 }
   0xb   : > { %p222_p3 = scmp.eq.s32.totalorder %s1956_s10, 1  ;;  %p1957_p5 = scmp.ge.s32.totalorder %s2570_s30, 1 }
   0xc   : > { %p2661_p4 = por %p3180_p1, %p45_p0  ;;  %p229_p7 = scmp.lt.s32.totalorder %s2570_s30, 3 }
   0xd   : > { %p2666_p6 = por %p222_p3, %p45_p0  ;;  %s2572_s14 = smov [#allocation5]  }
   0xe   : > { %s3186_s11 = scalar_select %p2661_p4, 1, 0 }
   0xf   : > { %s3187_s12 = scalar_select %p2666_p6, 1, 0 }
  0x10   : > { %p2671_p8 = pnand %p1957_p5, %p229_p7  ;;  %s253_s15 = sshll.u32 %s2572_s14, 4  ;;  %s254_s15 = int_to_ptr.vmem [resolvable:$true] %s253_s15 }
  0x11   : > { %s2573_s17 = smov [#allocation7]   ;;  %s2433_s19 = scalar_lea.vmem %s254_s15, 3072 }
  0x12   : > { %s3188_s13 = scalar_select %p2671_p8, 1, 0 }
  0x13   : > { %p2281_p9 = pneg %p2671_p8  ;;  %s266_s18 = sshll.u32 %s2573_s17, 4  ;;  %s267_s18 = int_to_ptr.vmem [resolvable:$true] %s266_s18 }
  0x14   : > { %p2434_p13 = scmp.ne.s32.totalorder %s254_s15, %s2433_s19  ;;  %p2441_p5 = scmp.lt.s32.totalorder %s254_s15, %s254_s15 }
  0x15   : > { %p2680_p11 = pnand %p2281_p9, %p3180_p1  ;;  %p2442_p7 = scmp.lt.s32.totalorder %s2433_s19, %s2433_s19 }
  0x17   : > { %p2424_p12 = pneg %p2680_p11  ;;  %p2443_p10 = por %p2442_p7, %p2441_p5 }
  0x19   : > { %p2436_p0 = pnand %p2434_p13, %p2424_p12 }
  0x1b   : > { %p2437_p3 = pneg %p2436_p0 }
  0x1d   : > { %p2444_p9 = pnand %p2443_p10, %p2437_p3 }
  0x1f   : > { %2447 = shalt.err (!%p2444_p9)
}
  0x20   : > { %s2574_s20 = smov 192   ;;  %s2575_s21 = smov 12  }
  0x21   : > { %s3190_s5 = sld [smem:[#allocation13_spill]]  ;;  %s2459_s24 = scalar_lea.vmem %s267_s18, 1024 }
  0x22   : > { %p2460_p1 = scmp.ne.s32.totalorder %s267_s18, %s2459_s24  ;;  %p2467_p2 = scmp.lt.s32.totalorder %s267_s18, %s267_s18 }
  0x23   : > { %p2468_p6 = scmp.lt.s32.totalorder %s2459_s24, %s2459_s24 }
  0x24   : > { %p2462_p13 = pnand %p2460_p1, %p2424_p12 }
  0x25   : > { %p2469_p5 = por %p2468_p6, %p2467_p2 }
  0x26   : > { %p2463_p0 = pneg %p2462_p13 }
  0x27   : > { %2284 = dma.hbm_to_vmem [thread:$0]  (!%p2680_p11), %s3190_s5, 3072, %s254_s15, [#allocation6], %s2574_s20, %s2574_s20, %s2575_s21  }
  0x28   : > { %p2470_p10 = pnand %p2469_p5, %p2463_p0 }
  0x2a   : > { %2473 = shalt.err (!%p2470_p10)
}
  0x2b   : > { %s2576_s25 = smov 64   ;;  %s2577_s26 = smov 4  }
  0x2c   : > { %s3191_s6 = sld [smem:[#allocation14_spill]]  ;;  %s2703_s15 = sadd.s32 1, %s2570_s30  }
  0x2d   : > { %s29_s17 = ssub.s32 %s2570_s30, %s2703_s15  ;;  %s32_s19 = sadd.s32 1, %s2566_s29 }
  0x2e   : > { %p30_p1 = scmp.eq.s32.totalorder %s29_s17, 0  ;;  %p39_p2 = scmp.ne.s32.totalorder %s2566_s29, %s2562_s28 }
  0x2f   : > { %p40_p6 = scmp.eq.s32.totalorder %s2570_s30, 0  ;;  %p3193_p3 = scmp.eq.s32.totalorder %s2652_s9, 1 }
  0x30   : > { %s2712_s20 = scalar_select %p30_p1, %s2566_s29, %s32_s19  }
  0x31   : > { %p41_p12 = por %p40_p6, %p39_p2  ;;  %p2716_p7 = por %p3193_p3, %p39_p2 }
  0x32   : > { %2287 = dma.hbm_to_vmem [thread:$0]  (!%p2680_p11), %s3191_s6, 1024, %s267_s18, [#allocation6], %s2576_s25, %s2576_s25, %s2577_s26  }
  0x33   : > { %3192 = sst [smem:[#allocation12_spill]] %s2712_s20  ;;  %p2298_p9 = scmp.lt.s32.totalorder %s2570_s30, 2 }
  0x34   : > { %s3194_s21 = scalar_select %p2716_p7, 1, 0 }
  0x35   : > { %s283_s16 = sand.u32 1, %s2566_s29   ;;  %s1962_s18 = sshll.u32 %s2570_s30, 7 }
  0x36   : > { %s1961_s22 = sshll.u32 %s283_s16, 3  ;;  %s2726_s25 = scalar_lea.hbm %s3171_s0, %s1962_s18 }
  0x37   : > { %s287_s26 = scalar_lea.vmem [#allocation2], %s1961_s22  ;;  %p2728_p11 = pnand %p2298_p9, %p41_p12 }
  0x38   : > { %s294_s10 = sshll.u32 %s287_s26, 4  ;;  %s284_s17 = scalar_lea.sflag [#allocation3], %s283_s16  ;;  %s295_s10 = int_to_ptr.vmem [resolvable:$true] %s294_s10 }
  0x39   : > { %s2474_s19 = scalar_lea.hbm %s2726_s25, 128  ;;  %p2476_p0 = pneg %p2728_p11 }
  0x3a   : > { %p2475_p13 = scmp.ne.s32.totalorder %s2726_s25, %s2474_s19  ;;  %s2479_s24 = scalar_lea.hbm %s3171_s0, 256 }
  0x3b   : > { %p2480_p1 = scmp.lt.s32.totalorder %s2726_s25, %s3171_s0  ;;  %p2481_p2 = scmp.lt.s32.totalorder %s2479_s24, %s2474_s19 }
  0x3c   : > { %p2477_p5 = pnand %p2476_p0, %p2475_p13 }
  0x3d   : > { %p2482_p6 = por %p2481_p2, %p2480_p1 }
  0x3e   : > { %p2478_p10 = pneg %p2477_p5 }
  0x40   : > { %p2483_p12 = pnand %p2482_p6, %p2478_p10 }
  0x42   : > { %2486 = shalt.err (!%p2483_p12)
}
  0x43   : > { %s2487_s26 = scalar_lea.vmem %s295_s10, 128  ;;  %s2578_s16 = smov [#allocation2]  }
  0x44   : > { %p2488_p3 = scmp.ne.s32.totalorder %s295_s10, %s2487_s26  ;;  %s2492_s6 = sshll.u32 %s2578_s16, 4  ;;  %s2493_s6 = int_to_ptr.vmem [resolvable:$false] %s2492_s6 }
  0x45   : > { %s2494_s20 = scalar_lea.vmem %s2493_s6, 256  ;;  %p2495_p13 = scmp.lt.s32.totalorder %s295_s10, %s2493_s6 }
  0x46   : > { %p2490_p9 = pnand %p2488_p3, %p2476_p0  ;;  %p2496_p5 = scmp.lt.s32.totalorder %s2494_s20, %s2487_s26 }
  0x48   : > { %p2491_p7 = pneg %p2490_p9  ;;  %p2497_p4 = por %p2496_p5, %p2495_p13 }
  0x4a   : > { %p2498_p8 = pnand %p2497_p4, %p2491_p7 }
  0x4c   : > { %2501 = shalt.err (!%p2498_p8)
}
  0x4d   : > { %2291 = dma.hbm_to_vmem [thread:$0]  (!%p2728_p11), %s2726_s25, 128, %s295_s10, %s284_s17  }
  0x4e   : > { %p3196_p10 = scmp.ne.s32.totalorder %s3188_s13, 0 }
  0x4f   : > { %s2749_s5 = sand.u32 (!%p3196_p10), 1, %s2562_s28   ;;  %p3197_p4 = scmp.ne.s32.totalorder (!%p3196_p10), %s3186_s11, 0 }
  0x50   : > { %303 = sbr.rel (%p3196_p10) target bundleno = 3118 (0xc2e), region = 52  ;;  %s1964_s19 = sshll.u32 (!%p3196_p10), %s2749_s5, 3 }
  0x51   : > { %s306_s6 = scalar_lea.sflag (!%p3196_p10), [#allocation3], %s2749_s5  ;;  %s309_s20 = scalar_lea.vmem (!%p3196_p10), [#allocation2], %s1964_s19 }
  0x55   : > { %2545 = dma.done.wait (%p3197_p4), %s306_s6, 128  }
  0x56   : > { %2547 = vsyncadd (%p3197_p4), %s306_s6, 4294967168  ;;  %p3198_p8 = scmp.eq.s32.totalorder %s2652_s9, 0 }
  0x58   : > { %2549 = dma.done.wait (%p3198_p8), [#allocation6], 4096   ;;  %p3199_p7 = pmov %p3198_p8 }
  0x59   : > { %v2763_v0 = vld [vmem:[%s309_s20] sm:$0xff]  ;;  %v2579_v3 = vmov 0.0   ;;  %v2792_v14 = vld [vmem:[#allocation5 + $0x80] ss:$12 sps:$4 sm:$0xff]   ;;  %v2580_v22 = vmov 0   ;;  %vm2581_vm0 = vmmov 0  }
  0x5a   : > { %2551 = vsyncadd (%p3199_p7), [#allocation6], 4294963200  ;;  %408 = vadd.xlane.f32.xlu0 %v2763_v0  ;;  %v2766_v1 = vld [vmem:[#allocation5 + $0xac] ss:$12 sps:$4 sm:$0xff]   ;;  %v2768_v2 = vld [vmem:[#allocation5 + $0xa8] ss:$12 sps:$4 sm:$0xff]   ;;  %2093 = vmatprep.subr.bf16.mxu1 %v2579_v3 }
  0x5b   : > { %v2771_v4 = vld [vmem:[#allocation5 + $0xb0] ss:$12 sps:$4 sm:$0xff]   ;;  %v2773_v5 = vld [vmem:[#allocation5 + $0x94] ss:$12 sps:$4 sm:$0xff]   ;;  %563 = vmatprep.subr.bf16.mxu0 %v2766_v1  ;;  %v2780_v7 = vld [vmem:[#allocation5 + $0x98] ss:$12 sps:$4 sm:$0xff]   ;;  %595 = vmatprep.mubr.bf16.mxu0 %v2580_v22 }
  0x5c   : > { %564 = vmatpush1.bf16.msra.mxu0 %v2768_v2  ;;  %2094 = vmatpush3.bf16.msra.mxu1 %v2771_v4  ;;  %v2778_v6 = vld [vmem:[#allocation5 + $0x90] ss:$12 sps:$4 sm:$0xff]   ;;  %v2790_v13 = vld [vmem:[#allocation5 + $0x78] ss:$12 sps:$4 sm:$0xff]   ;;  %v2800_v16 = vld [vmem:[#allocation5 + $0x60] ss:$12 sps:$4 sm:$0xff]  }
  0x5d   : > { %565 = vmatprep.subr.bf16.mxu0 %v2773_v5  ;;  %2095 = vmatprep.subr.bf16.mxu1 %v2579_v3  ;;  %v2788_v12 = vld [vmem:[#allocation5 + $0x7c] ss:$12 sps:$4 sm:$0xff]   ;;  %v2797_v15 = vld [vmem:[#allocation5 + $0x64] ss:$12 sps:$4 sm:$0xff]   ;;  %v2804_v18 = vld [vmem:[#allocation5 + $0x4c] ss:$12 sps:$4 sm:$0xff]  }
  0x5e   : > { %v2802_v17 = vld [vmem:[#allocation5 + $0x68] ss:$12 sps:$4 sm:$0xff]   ;;  %v2811_v20 = vld [vmem:[#allocation5 + $0x50] ss:$12 sps:$4 sm:$0xff]   ;;  %2109 = vmatprep.mubr.msk.bf16.mxu1 %vm2581_vm0, %v2579_v3  ;;  %v2824_v24 = vld [vmem:[#allocation5 + $0x38] ss:$12 sps:$4 sm:$0xff]  }
  0x5f   : > { %v2809_v19 = vld [vmem:[#allocation5 + $0x48] ss:$12 sps:$4 sm:$0xff]   ;;  %v2822_v23 = vld [vmem:[#allocation5 + $0x30] ss:$12 sps:$4 sm:$0xff]   ;;  %v2832_v26 = vld [vmem:[#allocation5 + $0x18] ss:$12 sps:$4 sm:$0xff]  }
  0x60   : > { %566 = vmatpush1.bf16.msra.mxu0 %v2778_v6  ;;  %2096 = vmatpush3.bf16.msra.mxu1 %v2780_v7  ;;  %v2815_v21 = vld [vmem:[#allocation5 + $0x34] ss:$12 sps:$4 sm:$0xff]   ;;  %v2828_v25 = vld [vmem:[#allocation5 + $0x1c] ss:$12 sps:$4 sm:$0xff]   ;;  %v2838_v28 = vld [vmem:[#allocation5 + $0x4] ss:$12 sps:$4 sm:$0xff]  }
  0x61   : > { %2097 = vmatprep.subr.bf16.mxu1 %v2579_v3  ;;  %567 = vmatprep.subr.bf16.mxu0 %v2788_v12  ;;  %v2834_v27 = vld [vmem:[#allocation5 + $0x20] ss:$12 sps:$4 sm:$0xff]   ;;  %v2844_v30 = vld [vmem:[#allocation5 + $0x8] ss:$12 sps:$4 sm:$0xff]   ;;  %v1968_v35 = vld [vmem:[%s3172_s1] ss:$0 sm:$0xff] }
  0x62   : > { %v2842_v29 = vld [vmem:[#allocation5] ss:$12 sps:$4 sm:$0xff]   ;;  %v1969_v37 = vld [vmem:[%s3173_s2] ss:$0 sm:$0xff]  ;;  %vm921_vm1 = vcmask 1043456   ;;  %vm686_vm2 = vcmask 261120  }
  0x63   : > { %s2582_s14 = smov 64   ;;  %s2583_s17 = smov 96   ;;  %vm877_vm4 = vcmask 64512   ;;  %vm1124_vm5 = vcmask 523264   ;;  %vm1126_vm6 = vcmask 785408  }
  0x64   : > { %568 = vmatpush1.bf16.msra.mxu0 %v2790_v13  ;;  %2098 = vmatpush3.bf16.msra.mxu1 %v2792_v14  ;;  %s2584_s18 = smov 32   ;;  %s2022_s20 = sshll.u32 %s2652_s9, 7 }
  0x65   : > { %2099 = vmatprep.subr.bf16.mxu1 %v2579_v3  ;;  %569 = vmatprep.subr.bf16.mxu0 %v2797_v15  ;;  %s349_s11 = scalar_lea.vmem [#allocation8], %s1964_s19  ;;  %s1854_s9 = scalar_lea.sflag [#allocation4], %s2749_s5 }
  0x66   : > { %s1867_s13 = sshll.u32 %s349_s11, 4  ;;  %p3202_p0 = scmp.ne.s32.totalorder %s3194_s21, 0  ;;  %s3130_s13 = int_to_ptr.vmem [resolvable:$true] %s1867_s13 }
  0x67   : > { %s2502_s19 = scalar_lea.vmem %s3130_s13, 128 }
  0x68   : > { %570 = vmatpush1.bf16.msra.mxu0 %v2800_v16  ;;  %2100 = vmatpush3.bf16.msra.mxu1 %v2802_v17  ;;  %p2503_p11 = scmp.ne.s32.totalorder %s3130_s13, %s2502_s19 }
  0x69   : > { %571 = vmatprep.subr.bf16.mxu0 %v2804_v18  ;;  %2101 = vmatprep.subr.bf16.mxu1 %v2579_v3 }
  0x6a   : > { %p2504_p1 = pnand %p2503_p11, %p3202_p0 }
  0x6c   : > { %572 = vmatpush1.bf16.msra.mxu0 %v2809_v19  ;;  %2102 = vmatpush3.bf16.msra.mxu1 %v2811_v20  ;;  %p2505_p2 = pneg %p2504_p1 }
  0x6d   : > { %573 = vmatprep.subr.bf16.mxu0 %v2815_v21  ;;  %2103 = vmatprep.subr.bf16.mxu1 %v2579_v3 }
  0x70   : > { %574 = vmatpush1.bf16.msra.mxu0 %v2822_v23  ;;  %2104 = vmatpush3.bf16.msra.mxu1 %v2824_v24 }
  0x71   : > { %575 = vmatprep.subr.bf16.mxu0 %v2828_v25  ;;  %2105 = vmatprep.subr.bf16.mxu1 %v2579_v3 }
  0x74   : > { %576 = vmatpush1.bf16.msra.mxu0 %v2832_v26  ;;  %2106 = vmatpush3.bf16.msra.mxu1 %v2834_v27 }
  0x75   : > { %577 = vmatprep.subr.bf16.mxu0 %v2838_v28  ;;  %2107 = vmatprep.subr.bf16.mxu1 %v2579_v3 }
  0x78   : > { %578 = vmatpush1.bf16.msra.mxu0 %v2842_v29  ;;  %2108 = vmatpush3.bf16.msra.mxu1 %v2844_v30 }
  0x79   : > { %2137 = vmatprep.subr.bf16.mxu0 %v2579_v3  ;;  %2113 = vmatprep.subr.bf16.mxu1 %v2579_v3 }
  0xe3   : > { %v409_v8 = vpop.xlane.xlu0 %408 }
  0xe4   : > { %v411_v9 = vmul.f32 0.0078125, %v409_v8 }
  0xe6   : > { %v412_v10 = vsub.f32 %v2763_v0, %v411_v9 }
  0xe8   : > { %v413_v11 = vmul.f32 %v412_v10, %v412_v10 }
  0xea   : > { %414 = vadd.xlane.f32.xlu0 %v413_v11 }
 0x173   : > { %v415_v31 = vpop.xlane.xlu0 %414 }
 0x174   : > { %v416_v32 = vmul.f32 0.0078125, %v415_v31 }
 0x176   : > { %v417_v33 = vadd.f32 1e-05, %v416_v32  ;;  %v352_v32 = vlaneseq }
 0x178   : > { %2386 = vrsqrt.f32 %v417_v33  ;;  %v353_v33 = vshrl.u32 %v352_v32, 7 }
 0x185   : > { %v2387_v34 = vpop.eup %2386 }
 0x186   : > { %v419_v36 = vmul.f32 %v2387_v34, %v412_v10  ;;  %v355_v34 = vand.u32 127, %v352_v32 }
 0x188   : > { %v426_v38 = vmul.f32 %v1968_v35, %v419_v36  ;;  %vm2894_vm3 = vcmp.gt.s32.totalorder %v355_v34, %v353_v33 }
 0x18a   : > { %v433_v39 = vadd.f32 %v1969_v37, %v426_v38 }
 0x18c   : > { %v434_v40 = vpack.c.bf16 %v433_v39, %v433_v39 }
 0x18e   : > { %596 = vmatmul.mubr.bf16.vlgmr.msra.gmra.mxu0 %v434_v40  ;;  %2110 = vmatmul.mubr.bf16.vlgmr.msra.gmra.mxu1 %v434_v40 }
 0x18f   : > { %2115 = vmatprep.mubr.msk.bf16.mxu1 %vm2581_vm0, %v2579_v3  ;;  %2139 = vmatprep.mubr.msk.bf16.mxu0 %vm2581_vm0, %v2579_v3 }
 0x24e   : > { %v597_v41 = vpop.f32.mrf.mxu0  ;;  %v2862_v42 = vpop.f32.mrf.mxu1 }
 0x24f   : > { %v682_v43 = vpack.c.bf16 %v2862_v42, %v2862_v42  ;;  %v654_v53 = vpack.c.bf16 %v597_v41, %v597_v41 }
 0x250   : > { %v599_v44 = vpop.f32.mrf.mxu0  ;;  %v2111_v45 = vpop.f32.mrf.mxu1 }
 0x251   : > { %662 = vrot.lane.b32.xlu0 %v599_v44, %s2582_s14  ;;  %659 = vrot.lane.b32.xlu1 %v599_v44, %s2583_s17  ;;  %v923_v46 = vsel %vm921_vm1, %v682_v43, 0  ;;  %v668_v47 = vpack.c.bf16 %v599_v44, %v599_v44 }
 0x252   : > { %v601_v48 = vpop.f32.mrf.mxu0  ;;  %v641_v49 = vpop.f32.mrf.mxu1  ;;  %2138 = vmatpush3.bf16.msra.mxu0 %v923_v46 }
 0x253   : > { %v691_v50 = vsel %vm686_vm2, %v668_v47, 0  ;;  %2149 = vmatprep.subr.bf16.mxu0 %v2579_v3 }
 0x254   : > { %v602_v51 = vpop.f32.mrf.mxu0  ;;  %v2112_v52 = vpop.f32.mrf.mxu1  ;;  %2114 = vmatpush3.bf16.xpose.msra.mxu1 %v691_v50 }
 0x255   : > { %645 = vrot.lane.b32.xlu1 %v597_v41, %s2583_s17  ;;  %2119 = vmatprep.subr.bf16.mxu1 %v2579_v3 }
 0x259   : > { %648 = vrot.lane.b32.xlu1 %v597_v41, %s2582_s14 }
 0x25b   : > { %2116 = vmatmul.mubr.msk.bf16.vlgmr.msra.gmra.mxu1 %vm686_vm2, %v654_v53 }
 0x25c   : > { %2121 = vmatprep.mubr.msk.bf16.mxu1 %vm2581_vm0, %v2579_v3 }
 0x25d   : > { %665 = vrot.lane.b32.xlu1 %v599_v44, %s2584_s18 }
 0x261   : > { %651 = vrot.lane.b32.xlu1 %v597_v41, %s2584_s18 }
 0x2c3   : > { %v660_v54 = vpop.permute.xlu1 %659  ;;  %v663_v57 = vpop.permute.xlu0 %662 }
 0x2c4   : > { %v669_v55 = vpack.c.bf16 %v660_v54, %v660_v54  ;;  %v670_v59 = vpack.c.bf16 %v663_v57, %v663_v57 }
 0x2c6   : > { %v737_v56 = vsel %vm686_vm2, %v669_v55, 0  ;;  %v783_v62 = vsel %vm686_vm2, %v670_v59, 0 }
 0x2c7   : > { %v646_v58 = vpop.permute.xlu1 %645  ;;  %2120 = vmatpush3.bf16.xpose.msra.mxu1 %v737_v56 }
 0x2c8   : > { %2125 = vmatprep.subr.bf16.mxu1 %v2579_v3  ;;  %v655_v61 = vpack.c.bf16 %v646_v58, %v646_v58 }
 0x2cb   : > { %v649_v60 = vpop.permute.xlu1 %648 }
 0x2cc   : > { %v656_v9 = vpack.c.bf16 %v649_v60, %v649_v60 }
 0x2ce   : > { %2122 = vmatmul.mubr.msk.bf16.vlgmr.msra.gmra.mxu1 %vm686_vm2, %v655_v61 }
 0x2cf   : > { %v666_v63 = vpop.permute.xlu1 %665  ;;  %2126 = vmatpush3.bf16.xpose.msra.mxu1 %v783_v62  ;;  %2127 = vmatprep.mubr.msk.bf16.mxu1 %vm2581_vm0, %v2579_v3 }
 0x2d0   : > { %2131 = vmatprep.subr.bf16.mxu1 %v2579_v3  ;;  %v671_v8 = vpack.c.bf16 %v666_v63, %v666_v63 }
 0x2d2   : > { %v829_v10 = vsel %vm686_vm2, %v671_v8, 0 }
 0x2d3   : > { %v652_v11 = vpop.permute.xlu1 %651 }
 0x2d4   : > { %v657_v31 = vpack.c.bf16 %v652_v11, %v652_v11 }
 0x2d6   : > { %2128 = vmatmul.mubr.msk.bf16.vlgmr.msra.gmra.mxu1 %vm686_vm2, %v656_v9 }
 0x2d7   : > { %2132 = vmatpush3.bf16.xpose.msra.mxu1 %v829_v10  ;;  %2133 = vmatprep.mubr.msk.bf16.mxu1 %vm2581_vm0, %v2579_v3 }
 0x2d8   : > { %2143 = vmatprep.subr.bf16.mxu1 %v2579_v3 }
 0x2de   : > { %2134 = vmatmul.mubr.msk.bf16.vlgmr.msra.gmra.mxu1 %vm686_vm2, %v657_v31 }
 0x2df   : > { %2145 = vmatprep.mubr.msk.bf16.mxu1 %vm2581_vm0, %v2579_v3 }
 0x31b   : > { %v727_v36 = vpop.f32.mrf.mxu1 }
 0x31c   : > { %v873_v37 = vsel %vm2894_vm3, -inf, %v727_v36 }
 0x31d   : > { %v2117_v38 = vpop.f32.mrf.mxu1  ;;  %v878_v39 = vsel %vm877_vm4, %v873_v37, -inf }
 0x31e   : > { %879 = vmax.xlane.f32.xlu1 %v878_v39 }
 0x31f   : > { %v730_v40 = vpop.f32.mrf.mxu1 }
 0x321   : > { %v2118_v41 = vpop.f32.mrf.mxu1 }
 0x32f   : > { %676 = vrot.lane.b32.xlu1 %v2862_v42, %s2582_s14 }
 0x38e   : > { %v773_v43 = vpop.f32.mrf.mxu1 }
 0x38f   : > { %v874_v44 = vsel %vm2894_vm3, -inf, %v773_v43 }
 0x390   : > { %v2123_v45 = vpop.f32.mrf.mxu1  ;;  %v881_v46 = vsel %vm877_vm4, %v874_v44, -inf }
 0x391   : > { %882 = vmax.xlane.f32.xlu0 %v881_v46 }
 0x392   : > { %v776_v47 = vpop.f32.mrf.mxu1 }
 0x394   : > { %v2124_v48 = vpop.f32.mrf.mxu1 }
 0x396   : > { %v819_v49 = vpop.f32.mrf.mxu1 }
 0x397   : > { %v875_v50 = vsel %vm2894_vm3, -inf, %v819_v49 }
 0x398   : > { %v2129_v51 = vpop.f32.mrf.mxu1  ;;  %v884_v52 = vsel %vm877_vm4, %v875_v50, -inf }
 0x399   : > { %885 = vmax.xlane.f32.xlu1 %v884_v52 }
 0x39a   : > { %v822_v53 = vpop.f32.mrf.mxu1 }
 0x39c   : > { %v2130_v54 = vpop.f32.mrf.mxu1 }
 0x39e   : > { %v865_v55 = vpop.f32.mrf.mxu1 }
 0x39f   : > { %v876_v56 = vsel %vm2894_vm3, -inf, %v865_v55 }
 0x3a0   : > { %v2135_v57 = vpop.f32.mrf.mxu1  ;;  %v887_v58 = vsel %vm877_vm4, %v876_v56, -inf }
 0x3a1   : > { %888 = vmax.xlane.f32.xlu1 %v887_v58 }
 0x3a2   : > { %v868_v59 = vpop.f32.mrf.mxu1 }
 0x3a4   : > { %v2136_v60 = vpop.f32.mrf.mxu1 }
 0x3a5   : > { %v2982_v60 = vld [vmem:[#allocation7] sm:$0xff]  }
 0x3a7   : > { %v880_v61 = vpop.xlane.xlu1 %879  ;;  %673 = vrot.lane.b32.xlu0 %v2862_v42, %s2583_s17 }
 0x3a8   : > { %v890_v62 = vsub.f32 %v873_v37, %v880_v61 }
 0x3aa   : > { %v894_v63 = vmul.f32 1.442695, %v890_v62 }
 0x3ab   : > { %v677_v8 = vpop.permute.xlu1 %676 }
 0x3ac   : > { %2388 = vpow2.f32 %v894_v63  ;;  %v684_v9 = vpack.c.bf16 %v677_v8, %v677_v8 }
 0x3ae   : > { %v1015_v31 = vsel %vm921_vm1, %v684_v9, 0 }
 0x3b2   : > { %679 = vrot.lane.b32.xlu1 %v2862_v42, %s2584_s18 }
 0x3b9   : > { %v2389_v10 = vpop.eup %2388 }
 0x3ba   : > { %v914_v11 = vpack.c.bf16 %v2389_v10, %v2389_v10 }
 0x3bc   : > { %2140 = vmatmul.mubr.msk.bf16.vlgmr.msra.gmra.mxu0 %vm877_vm4, %v914_v11 }
 0x3bd   : > { %2150 = vmatpush3.bf16.msra.mxu0 %v1015_v31  ;;  %2151 = vmatprep.mubr.msk.bf16.mxu0 %vm2581_vm0, %v2579_v3 }
 0x3be   : > { %2161 = vmatprep.subr.bf16.mxu0 %v2579_v3 }
 0x41a   : > { %v883_v32 = vpop.xlane.xlu0 %882 }
 0x41b   : > { %v891_v33 = vsub.f32 %v874_v44, %v883_v32 }
 0x41d   : > { %v896_v34 = vmul.f32 1.442695, %v891_v33 }
 0x41e   : > { %v674_v36 = vpop.permute.xlu0 %673 }
 0x41f   : > { %2390 = vpow2.f32 %v896_v34  ;;  %v683_v42 = vpack.c.bf16 %v674_v36, %v674_v36 }
 0x421   : > { %v969_v37 = vsel %vm921_vm1, %v683_v42, 0 }
 0x422   : > { %2144 = vmatpush3.bf16.msra.mxu1 %v969_v37  ;;  %v886_v38 = vpop.xlane.xlu1 %885 }
 0x423   : > { %v892_v39 = vsub.f32 %v875_v50, %v886_v38  ;;  %2155 = vmatprep.subr.bf16.mxu1 %v2579_v3 }
 0x425   : > { %v898_v40 = vmul.f32 1.442695, %v892_v39 }
 0x427   : > { %2392 = vpow2.f32 %v898_v40 }
 0x42a   : > { %v889_v41 = vpop.xlane.xlu1 %888 }
 0x42b   : > { %v893_v43 = vsub.f32 %v876_v56, %v889_v41 }
 0x42c   : > { %v2391_v45 = vpop.eup %2390 }
 0x42d   : > { %v900_v46 = vmul.f32 1.442695, %v893_v43  ;;  %v905_v47 = vsel %vm877_vm4, %v2391_v45, 0.0  ;;  %v915_v44 = vpack.c.bf16 %v2391_v45, %v2391_v45 }
 0x42e   : > { %906 = vadd.xlane.f32.xlu0 %v905_v47  ;;  %v680_v48 = vpop.permute.xlu1 %679 }
 0x42f   : > { %2394 = vpow2.f32 %v900_v46  ;;  %v685_v49 = vpack.c.bf16 %v680_v48, %v680_v48  ;;  %2146 = vmatmul.mubr.msk.bf16.vlgmr.msra.gmra.mxu1 %vm877_vm4, %v915_v44 }
 0x430   : > { %2157 = vmatprep.mubr.msk.bf16.mxu1 %vm2581_vm0, %v2579_v3 }
 0x431   : > { %v1061_v50 = vsel %vm921_vm1, %v685_v49, 0 }
 0x432   : > { %2156 = vmatpush3.bf16.msra.mxu1 %v1061_v50 }
 0x433   : > { %1252 = vmatprep.subr.bf16.mxu1 %v2766_v1  ;;  %v902_v1 = vsel %vm877_vm4, %v2389_v10, 0.0 }
 0x434   : > { %v2393_v51 = vpop.eup %2392 }
 0x435   : > { %v908_v52 = vsel %vm877_vm4, %v2393_v51, 0.0  ;;  %v916_v53 = vpack.c.bf16 %v2393_v51, %v2393_v51 }
 0x436   : > { %909 = vadd.xlane.f32.xlu1 %v908_v52 }
 0x437   : > { %2152 = vmatmul.mubr.msk.bf16.vlgmr.msra.gmra.mxu0 %vm877_vm4, %v916_v53 }
 0x438   : > { %2177 = vmatprep.mubr.msk.bf16.mxu0 %vm2581_vm0, %v2579_v3 }
 0x43c   : > { %v2395_v54 = vpop.eup %2394 }
 0x43d   : > { %v911_v55 = vsel %vm877_vm4, %v2395_v54, 0.0  ;;  %v917_v56 = vpack.c.bf16 %v2395_v54, %v2395_v54 }
 0x43e   : > { %912 = vadd.xlane.f32.xlu0 %v911_v55 }
 0x43f   : > { %2158 = vmatmul.mubr.msk.bf16.vlgmr.msra.gmra.mxu1 %vm877_vm4, %v917_v56  ;;  %v2012_v56 = vld [vmem:[%s3175_s4] ss:$0 sm:$0xff] }
 0x440   : > { %1253 = vmatpush1.bf16.msra.mxu1 %v2768_v2  ;;  %1284 = vmatprep.mubr.bf16.mxu1 %v2580_v22 }
 0x441   : > { %1254 = vmatprep.subr.bf16.mxu1 %v2773_v5 }
 0x442   : > { %903 = vadd.xlane.f32.xlu0 %v902_v1 }
 0x444   : > { %1255 = vmatpush1.bf16.msra.mxu1 %v2778_v6 }
 0x445   : > { %1256 = vmatprep.subr.bf16.mxu1 %v2788_v12 }
 0x448   : > { %1257 = vmatpush1.bf16.msra.mxu1 %v2790_v13  ;;  %v2953_v13 = vld [vmem:[#allocation7 + $0x38] sm:$0xff]  }
 0x449   : > { %1258 = vmatprep.subr.bf16.mxu1 %v2797_v15  ;;  %2162 = vmatpush3.bf16.msra.mxu0 %v2953_v13  ;;  %v2956_v15 = vld [vmem:[#allocation7 + $0x30] sm:$0xff]  }
 0x44a   : > { %2163 = vmatprep.subr.bf16.mxu0 %v2579_v3 }
 0x44c   : > { %1259 = vmatpush1.bf16.msra.mxu1 %v2800_v16  ;;  %v2960_v16 = vld [vmem:[#allocation7 + $0x28] sm:$0xff]  }
 0x44d   : > { %1260 = vmatprep.subr.bf16.mxu1 %v2804_v18  ;;  %2164 = vmatpush3.bf16.msra.mxu0 %v2956_v15 }
 0x44e   : > { %2165 = vmatprep.subr.bf16.mxu0 %v2579_v3 }
 0x450   : > { %1261 = vmatpush1.bf16.msra.mxu1 %v2809_v19  ;;  %v2965_v19 = vld [vmem:[#allocation7 + $0x20] sm:$0xff]  }
 0x451   : > { %1262 = vmatprep.subr.bf16.mxu1 %v2815_v21  ;;  %2166 = vmatpush3.bf16.msra.mxu0 %v2960_v16  ;;  %v2968_v21 = vld [vmem:[#allocation7 + $0x18] sm:$0xff]  }
 0x452   : > { %2167 = vmatprep.subr.bf16.mxu0 %v2579_v3 }
 0x454   : > { %1263 = vmatpush1.bf16.msra.mxu1 %v2822_v23  ;;  %v2973_v23 = vld [vmem:[#allocation7 + $0x10] sm:$0xff]  }
 0x455   : > { %1264 = vmatprep.subr.bf16.mxu1 %v2828_v25  ;;  %2168 = vmatpush3.bf16.msra.mxu0 %v2965_v19  ;;  %v2976_v25 = vld [vmem:[#allocation7 + $0x8] sm:$0xff]  }
 0x456   : > { %2169 = vmatprep.subr.bf16.mxu0 %v2579_v3 }
 0x458   : > { %1265 = vmatpush1.bf16.msra.mxu1 %v2832_v26 }
 0x459   : > { %1266 = vmatprep.subr.bf16.mxu1 %v2838_v28  ;;  %2170 = vmatpush3.bf16.msra.mxu0 %v2968_v21 }
 0x45a   : > { %2171 = vmatprep.subr.bf16.mxu0 %v2579_v3 }
 0x45c   : > { %1267 = vmatpush1.bf16.msra.mxu1 %v2842_v29 }
 0x45d   : > { %2201 = vmatprep.subr.bf16.mxu1 %v2579_v3  ;;  %2172 = vmatpush3.bf16.msra.mxu0 %v2973_v23 }
 0x45e   : > { %2173 = vmatprep.subr.bf16.mxu0 %v2579_v3 }
 0x461   : > { %2174 = vmatpush3.bf16.msra.mxu0 %v2976_v25 }
 0x462   : > { %2175 = vmatprep.subr.bf16.mxu0 %v2579_v3 }
 0x465   : > { %2176 = vmatpush3.bf16.msra.mxu0 %v2982_v60 }
 0x466   : > { %2181 = vmatprep.subr.bf16.mxu0 %v2579_v3 }
 0x47c   : > { %v959_v2 = vpop.f32.mrf.mxu0 }
 0x47e   : > { %v2141_v5 = vpop.f32.mrf.mxu0 }
 0x480   : > { %v962_v6 = vpop.f32.mrf.mxu0 }
 0x482   : > { %v2142_v12 = vpop.f32.mrf.mxu0 }
 0x4b7   : > { %v907_v18 = vpop.xlane.xlu0 %906 }
 0x4b8   : > { %2396 = vrcp.f32 %v907_v18 }
 0x4bf   : > { %v910_v22 = vpop.xlane.xlu1 %909 }
 0x4c0   : > { %2398 = vrcp.f32 %v910_v22 }
 0x4c5   : > { %v2397_v26 = vpop.eup %2396 }
 0x4c7   : > { %v913_v28 = vpop.xlane.xlu0 %912 }
 0x4c8   : > { %2400 = vrcp.f32 %v913_v28 }
 0x4cb   : > { %v904_v37 = vpop.xlane.xlu0 %903 }
 0x4cc   : > { %2402 = vrcp.f32 %v904_v37 }
 0x4cd   : > { %v2399_v62 = vpop.eup %2398 }
 0x4d5   : > { %v2401_v31 = vpop.eup %2400 }
 0x4d9   : > { %v2403_v38 = vpop.eup %2402 }
 0x4da   : > { %v1107_v40 = vmul.f32 %v2403_v38, %v959_v2 }
 0x4ef   : > { %v1005_v29 = vpop.f32.mrf.mxu1 }
 0x4f0   : > { %v1108_v57 = vmul.f32 %v2397_v26, %v1005_v29 }
 0x4f1   : > { %v2147_v58 = vpop.f32.mrf.mxu1 }
 0x4f2   : > { %1112 = vrot.lane.b32.xlu1 %v1108_v57, %s2584_s18 }
 0x4f3   : > { %v1008_v59 = vpop.f32.mrf.mxu1 }
 0x4f5   : > { %v2148_v61 = vpop.f32.mrf.mxu1 }
 0x4f7   : > { %v1051_v63 = vpop.f32.mrf.mxu0 }
 0x4f8   : > { %v1109_v8 = vmul.f32 %v2399_v62, %v1051_v63 }
 0x4f9   : > { %v2153_v9 = vpop.f32.mrf.mxu0 }
 0x4fa   : > { %1116 = vrot.lane.b32.xlu0 %v1109_v8, %s2582_s14 }
 0x4fb   : > { %v1054_v10 = vpop.f32.mrf.mxu0 }
 0x4fd   : > { %v2154_v11 = vpop.f32.mrf.mxu0 }
 0x4ff   : > { %v1097_v32 = vpop.f32.mrf.mxu1 }
 0x500   : > { %v1110_v33 = vmul.f32 %v2401_v31, %v1097_v32 }
 0x501   : > { %v2159_v34 = vpop.f32.mrf.mxu1 }
 0x502   : > { %1120 = vrot.lane.b32.xlu1 %v1110_v33, %s2583_s17 }
 0x503   : > { %v1100_v36 = vpop.f32.mrf.mxu1 }
 0x505   : > { %v2160_v42 = vpop.f32.mrf.mxu1 }
 0x564   : > { %v1113_v39 = vpop.permute.xlu1 %1112 }
 0x565   : > { %v1123_v43 = vsel %vm686_vm2, %v1107_v40, %v1113_v39 }
 0x56c   : > { %v1117_v41 = vpop.permute.xlu0 %1116 }
 0x56d   : > { %v1125_v45 = vsel %vm1124_vm5, %v1123_v43, %v1117_v41 }
 0x574   : > { %v1121_v46 = vpop.permute.xlu1 %1120 }
 0x575   : > { %v1127_v47 = vsel %vm1126_vm6, %v1125_v45, %v1121_v46 }
 0x576   : > { %v1128_v44 = vpack.c.bf16 %v1127_v47, %v1127_v47 }
 0x578   : > { %2178 = vmatmul.mubr.bf16.vlgmr.msra.gmra.mxu0 %v1128_v44 }
 0x579   : > { %2182 = vmatpush3.bf16.msra.mxu0 %v2771_v4  ;;  %2197 = vmatprep.mubr.msk.bf16.mxu0 %vm2581_vm0, %v2579_v3  ;;  %v3012_v4 = vld [vmem:[%s3178_s7] ss:$0 sm:$0xff] }
 0x57a   : > { %2183 = vmatprep.subr.bf16.mxu0 %v2579_v3 }
 0x57d   : > { %2184 = vmatpush3.bf16.msra.mxu0 %v2780_v7 }
 0x57e   : > { %2185 = vmatprep.subr.bf16.mxu0 %v2579_v3 }
 0x581   : > { %2186 = vmatpush3.bf16.msra.mxu0 %v2792_v14 }
 0x582   : > { %2187 = vmatprep.subr.bf16.mxu0 %v2579_v3 }
 0x585   : > { %2188 = vmatpush3.bf16.msra.mxu0 %v2802_v17 }
 0x586   : > { %2189 = vmatprep.subr.bf16.mxu0 %v2579_v3 }
 0x589   : > { %2190 = vmatpush3.bf16.msra.mxu0 %v2811_v20 }
 0x58a   : > { %2191 = vmatprep.subr.bf16.mxu0 %v2579_v3 }
 0x58d   : > { %2192 = vmatpush3.bf16.msra.mxu0 %v2824_v24 }
 0x58e   : > { %2193 = vmatprep.subr.bf16.mxu0 %v2579_v3 }
 0x591   : > { %2194 = vmatpush3.bf16.msra.mxu0 %v2834_v27 }
 0x592   : > { %2195 = vmatprep.subr.bf16.mxu0 %v2579_v3 }
 0x595   : > { %2196 = vmatpush3.bf16.msra.mxu0 %v2844_v30 }
 0x596   : > { %2225 = vmatprep.subr.bf16.mxu0 %v2579_v3 }
 0x638   : > { %v1217_v7 = vpop.f32.mrf.mxu0 }
 0x639   : > { %v1218_v14 = vadd.f32 %v3012_v4, %v1217_v7 }
 0x63a   : > { %v2179_v17 = vpop.f32.mrf.mxu0 }
 0x63b   : > { %v3016_v20 = vadd.f32 %v1218_v14, %v2763_v0  ;;  %v2011_v0 = vld [vmem:[%s3174_s3] ss:$0 sm:$0xff] }
 0x63c   : > { %v1220_v24 = vpop.f32.mrf.mxu0 }
 0x63d   : > { %1226 = vadd.xlane.f32.xlu1 %v3016_v20 }
 0x63e   : > { %v2180_v27 = vpop.f32.mrf.mxu0 }
 0x6c6   : > { %v1227_v48 = vpop.xlane.xlu1 %1226 }
 0x6c7   : > { %v1228_v30 = vmul.f32 0.0078125, %v1227_v48 }
 0x6c9   : > { %v1229_v49 = vsub.f32 %v3016_v20, %v1228_v30 }
 0x6cb   : > { %v1230_v50 = vmul.f32 %v1229_v49, %v1229_v49 }
 0x6cd   : > { %1231 = vadd.xlane.f32.xlu0 %v1230_v50 }
 0x756   : > { %v1232_v51 = vpop.xlane.xlu0 %1231 }
 0x757   : > { %v1233_v52 = vmul.f32 0.0078125, %v1232_v51 }
 0x759   : > { %v1234_v53 = vadd.f32 1e-05, %v1233_v52 }
 0x75b   : > { %2404 = vrsqrt.f32 %v1234_v53 }
 0x768   : > { %v2405_v54 = vpop.eup %2404 }
 0x769   : > { %v1236_v55 = vmul.f32 %v2405_v54, %v1229_v49 }
 0x76b   : > { %v1243_v1 = vmul.f32 %v2011_v0, %v1236_v55 }
 0x76d   : > { %v1250_v2 = vadd.f32 %v2012_v56, %v1243_v1 }
 0x76f   : > { %v1251_v5 = vpack.c.bf16 %v1250_v2, %v1250_v2 }
 0x771   : > { %1285 = vmatmul.mubr.bf16.vlgmr.msra.gmra.mxu1 %v1251_v5  ;;  %2198 = vmatmul.mubr.bf16.vlgmr.msra.gmra.mxu0 %v1251_v5 }
 0x772   : > { %2203 = vmatprep.mubr.msk.bf16.mxu1 %vm2581_vm0, %v2579_v3  ;;  %2227 = vmatprep.mubr.msk.bf16.mxu0 %vm2581_vm0, %v2579_v3 }
 0x831   : > { %v1286_v6 = vpop.f32.mrf.mxu1  ;;  %v3030_v12 = vpop.f32.mrf.mxu0 }
 0x832   : > { %1334 = vrot.lane.b32.xlu1 %v1286_v6, %s2583_s17  ;;  %v1371_v18 = vpack.c.bf16 %v3030_v12, %v3030_v12  ;;  %v1343_v63 = vpack.c.bf16 %v1286_v6, %v1286_v6 }
 0x833   : > { %v1288_v22 = vpop.f32.mrf.mxu1  ;;  %v2199_v26 = vpop.f32.mrf.mxu0 }
 0x834   : > { %1348 = vrot.lane.b32.xlu0 %v1288_v22, %s2583_s17  ;;  %v1607_v28 = vsel %vm921_vm1, %v1371_v18, 0  ;;  %v1357_v29 = vpack.c.bf16 %v1288_v22, %v1288_v22 }
 0x835   : > { %v1290_v57 = vpop.f32.mrf.mxu1  ;;  %v1330_v58 = vpop.f32.mrf.mxu0  ;;  %2226 = vmatpush3.bf16.msra.mxu0 %v1607_v28 }
 0x836   : > { %1351 = vrot.lane.b32.xlu1 %v1288_v22, %s2582_s14  ;;  %v1379_v59 = vsel %vm686_vm2, %v1357_v29, 0  ;;  %2237 = vmatprep.subr.bf16.mxu0 %v2579_v3 }
 0x837   : > { %v1291_v61 = vpop.f32.mrf.mxu1  ;;  %v2200_v62 = vpop.f32.mrf.mxu0  ;;  %2202 = vmatpush3.bf16.xpose.msra.mxu1 %v1379_v59 }
 0x838   : > { %1337 = vrot.lane.b32.xlu0 %v1286_v6, %s2582_s14  ;;  %2207 = vmatprep.subr.bf16.mxu1 %v2579_v3 }
 0x83a   : > { %1354 = vrot.lane.b32.xlu1 %v1288_v22, %s2584_s18 }
 0x83c   : > { %1340 = vrot.lane.b32.xlu0 %v1286_v6, %s2584_s18 }
 0x83e   : > { %2204 = vmatmul.mubr.msk.bf16.vlgmr.msra.gmra.mxu1 %vm686_vm2, %v1343_v63 }
 0x83f   : > { %2209 = vmatprep.mubr.msk.bf16.mxu1 %vm2581_vm0, %v2579_v3 }
 0x8a4   : > { %v1335_v8 = vpop.permute.xlu1 %1334 }
 0x8a5   : > { %v1344_v33 = vpack.c.bf16 %v1335_v8, %v1335_v8 }
 0x8a6   : > { %v1349_v9 = vpop.permute.xlu0 %1348 }
 0x8a7   : > { %v1358_v10 = vpack.c.bf16 %v1349_v9, %v1349_v9 }
 0x8a8   : > { %v1352_v31 = vpop.permute.xlu1 %1351 }
 0x8a9   : > { %v1425_v11 = vsel %vm686_vm2, %v1358_v10, 0  ;;  %v1359_v32 = vpack.c.bf16 %v1352_v31, %v1352_v31 }
 0x8aa   : > { %2208 = vmatpush3.bf16.xpose.msra.mxu1 %v1425_v11  ;;  %v1338_v42 = vpop.permute.xlu0 %1337 }
 0x8ab   : > { %2213 = vmatprep.subr.bf16.mxu1 %v2579_v3  ;;  %v1471_v34 = vsel %vm686_vm2, %v1359_v32, 0  ;;  %v1345_v38 = vpack.c.bf16 %v1338_v42, %v1338_v42 }
 0x8ac   : > { %v1355_v36 = vpop.permute.xlu1 %1354 }
 0x8ad   : > { %v1360_v37 = vpack.c.bf16 %v1355_v36, %v1355_v36 }
 0x8ae   : > { %v1341_v40 = vpop.permute.xlu0 %1340 }
 0x8af   : > { %v1517_v39 = vsel %vm686_vm2, %v1360_v37, 0  ;;  %v1346_v41 = vpack.c.bf16 %v1341_v40, %v1341_v40 }
 0x8b1   : > { %2210 = vmatmul.mubr.msk.bf16.vlgmr.msra.gmra.mxu1 %vm686_vm2, %v1344_v33 }
 0x8b2   : > { %2214 = vmatpush3.bf16.xpose.msra.mxu1 %v1471_v34  ;;  %2215 = vmatprep.mubr.msk.bf16.mxu1 %vm2581_vm0, %v2579_v3 }
 0x8b3   : > { %2219 = vmatprep.subr.bf16.mxu1 %v2579_v3 }
 0x8b9   : > { %2216 = vmatmul.mubr.msk.bf16.vlgmr.msra.gmra.mxu1 %vm686_vm2, %v1345_v38 }
 0x8ba   : > { %2220 = vmatpush3.bf16.xpose.msra.mxu1 %v1517_v39  ;;  %2221 = vmatprep.mubr.msk.bf16.mxu1 %vm2581_vm0, %v2579_v3 }
 0x8bb   : > { %2231 = vmatprep.subr.bf16.mxu1 %v2579_v3 }
 0x8c1   : > { %2222 = vmatmul.mubr.msk.bf16.vlgmr.msra.gmra.mxu1 %vm686_vm2, %v1346_v41 }
 0x8c2   : > { %2233 = vmatprep.mubr.msk.bf16.mxu1 %vm2581_vm0, %v2579_v3 }
 0x8fe   : > { %v1415_v43 = vpop.f32.mrf.mxu1 }
 0x8ff   : > { %v1559_v45 = vsel %vm2894_vm3, -inf, %v1415_v43 }
 0x900   : > { %v2205_v46 = vpop.f32.mrf.mxu1  ;;  %v1563_v47 = vsel %vm877_vm4, %v1559_v45, -inf }
 0x901   : > { %1564 = vmax.xlane.f32.xlu1 %v1563_v47 }
 0x902   : > { %v1418_v44 = vpop.f32.mrf.mxu1 }
 0x904   : > { %v2206_v7 = vpop.f32.mrf.mxu1 }
 0x912   : > { %1365 = vrot.lane.b32.xlu1 %v3030_v12, %s2582_s14 }
 0x971   : > { %v1461_v14 = vpop.f32.mrf.mxu1 }
 0x972   : > { %v1560_v17 = vsel %vm2894_vm3, -inf, %v1461_v14 }
 0x973   : > { %v2211_v24 = vpop.f32.mrf.mxu1  ;;  %v1566_v27 = vsel %vm877_vm4, %v1560_v17, -inf }
 0x974   : > { %1567 = vmax.xlane.f32.xlu0 %v1566_v27 }
 0x975   : > { %v1464_v48 = vpop.f32.mrf.mxu1 }
 0x977   : > { %v2212_v30 = vpop.f32.mrf.mxu1 }
 0x979   : > { %v1507_v49 = vpop.f32.mrf.mxu1 }
 0x97a   : > { %v1561_v50 = vsel %vm2894_vm3, -inf, %v1507_v49 }
 0x97b   : > { %v2217_v51 = vpop.f32.mrf.mxu1  ;;  %v1569_v52 = vsel %vm877_vm4, %v1561_v50, -inf }
 0x97c   : > { %1570 = vmax.xlane.f32.xlu0 %v1569_v52 }
 0x97d   : > { %v1510_v53 = vpop.f32.mrf.mxu1 }
 0x97f   : > { %v2218_v54 = vpop.f32.mrf.mxu1 }
 0x981   : > { %v1553_v0 = vpop.f32.mrf.mxu1 }
 0x982   : > { %v1562_v55 = vsel %vm2894_vm3, -inf, %v1553_v0 }
 0x983   : > { %v2223_v56 = vpop.f32.mrf.mxu1  ;;  %v1572_v1 = vsel %vm877_vm4, %v1562_v55, -inf }
 0x984   : > { %1573 = vmax.xlane.f32.xlu1 %v1572_v1 }
 0x985   : > { %v1556_v2 = vpop.f32.mrf.mxu1 }
 0x987   : > { %v2224_v5 = vpop.f32.mrf.mxu1 }
 0x98a   : > { %v1565_v6 = vpop.xlane.xlu1 %1564 }
 0x98b   : > { %v1575_v18 = vsub.f32 %v1559_v45, %v1565_v6 }
 0x98d   : > { %v1579_v22 = vmul.f32 1.442695, %v1575_v18 }
 0x98e   : > { %v1366_v26 = vpop.permute.xlu1 %1365 }
 0x98f   : > { %2406 = vpow2.f32 %v1579_v22  ;;  %v1373_v28 = vpack.c.bf16 %v1366_v26, %v1366_v26 }
 0x991   : > { %v1699_v57 = vsel %vm921_vm1, %v1373_v28, 0 }
 0x992   : > { %1362 = vrot.lane.b32.xlu0 %v3030_v12, %s2583_s17 }
 0x995   : > { %1368 = vrot.lane.b32.xlu1 %v3030_v12, %s2584_s18 }
 0x99c   : > { %v2407_v35 = vpop.eup %2406 }
 0x99d   : > { %v1599_v29 = vpack.c.bf16 %v2407_v35, %v2407_v35 }
 0x99f   : > { %2228 = vmatmul.mubr.msk.bf16.vlgmr.msra.gmra.mxu0 %vm877_vm4, %v1599_v29 }
 0x9a0   : > { %2238 = vmatpush3.bf16.msra.mxu0 %v1699_v57  ;;  %2239 = vmatprep.mubr.msk.bf16.mxu0 %vm2581_vm0, %v2579_v3 }
 0x9a1   : > { %2249 = vmatprep.subr.bf16.mxu0 %v2579_v3 }
 0x9fd   : > { %v1568_v58 = vpop.xlane.xlu0 %1567 }
 0x9fe   : > { %v1576_v59 = vsub.f32 %v1560_v17, %v1568_v58 }
 0xa00   : > { %v1581_v61 = vmul.f32 1.442695, %v1576_v59 }
 0xa02   : > { %2408 = vpow2.f32 %v1581_v61 }
 0xa05   : > { %v1571_v62 = vpop.xlane.xlu0 %1570 }
 0xa06   : > { %v1577_v12 = vsub.f32 %v1561_v50, %v1571_v62 }
 0xa08   : > { %v1583_v63 = vmul.f32 1.442695, %v1577_v12 }
 0xa09   : > { %v1363_v8 = vpop.permute.xlu0 %1362 }
 0xa0a   : > { %2410 = vpow2.f32 %v1583_v63  ;;  %v1372_v9 = vpack.c.bf16 %v1363_v8, %v1363_v8 }
 0xa0c   : > { %v1653_v10 = vsel %vm921_vm1, %v1372_v9, 0 }
 0xa0d   : > { %v1574_v11 = vpop.xlane.xlu1 %1573  ;;  %2232 = vmatpush3.bf16.msra.mxu1 %v1653_v10 }
 0xa0e   : > { %v1578_v31 = vsub.f32 %v1562_v55, %v1574_v11  ;;  %2243 = vmatprep.subr.bf16.mxu1 %v2579_v3 }
 0xa0f   : > { %v2409_v32 = vpop.eup %2408 }
 0xa10   : > { %v1585_v33 = vmul.f32 1.442695, %v1578_v31  ;;  %v1590_v34 = vsel %vm877_vm4, %v2409_v32, 0.0  ;;  %v1600_v36 = vpack.c.bf16 %v2409_v32, %v2409_v32 }
 0xa11   : > { %v1369_v42 = vpop.permute.xlu1 %1368  ;;  %1591 = vadd.xlane.f32.xlu0 %v1590_v34 }
 0xa12   : > { %2412 = vpow2.f32 %v1585_v33  ;;  %v1374_v37 = vpack.c.bf16 %v1369_v42, %v1369_v42  ;;  %2234 = vmatmul.mubr.msk.bf16.vlgmr.msra.gmra.mxu1 %vm877_vm4, %v1600_v36 }
 0xa13   : > { %2245 = vmatprep.mubr.msk.bf16.mxu1 %vm2581_vm0, %v2579_v3 }
 0xa14   : > { %v1745_v38 = vsel %vm921_vm1, %v1374_v37, 0 }
 0xa15   : > { %2244 = vmatpush3.bf16.msra.mxu1 %v1745_v38 }
 0xa17   : > { %v2411_v39 = vpop.eup %2410 }
 0xa18   : > { %v1593_v40 = vsel %vm877_vm4, %v2411_v39, 0.0  ;;  %v1601_v41 = vpack.c.bf16 %v2411_v39, %v2411_v39 }
 0xa19   : > { %1594 = vadd.xlane.f32.xlu1 %v1593_v40 }
 0xa1a   : > { %2240 = vmatmul.mubr.msk.bf16.vlgmr.msra.gmra.mxu0 %vm877_vm4, %v1601_v41 }
 0xa1b   : > { %2250 = vmatpush3.bf16.msra.mxu0 %v2953_v13  ;;  %2265 = vmatprep.mubr.msk.bf16.mxu0 %vm2581_vm0, %v2579_v3  ;;  %v1587_v13 = vsel %vm877_vm4, %v2407_v35, 0.0 }
 0xa1c   : > { %2251 = vmatprep.subr.bf16.mxu0 %v2579_v3 }
 0xa1f   : > { %v2413_v43 = vpop.eup %2412  ;;  %2252 = vmatpush3.bf16.msra.mxu0 %v2956_v15 }
 0xa20   : > { %v1596_v45 = vsel %vm877_vm4, %v2413_v43, 0.0  ;;  %v1602_v46 = vpack.c.bf16 %v2413_v43, %v2413_v43  ;;  %2253 = vmatprep.subr.bf16.mxu0 %v2579_v3 }
 0xa21   : > { %1597 = vadd.xlane.f32.xlu0 %v1596_v45 }
 0xa22   : > { %2246 = vmatmul.mubr.msk.bf16.vlgmr.msra.gmra.mxu1 %vm877_vm4, %v1602_v46 }
 0xa23   : > { %2254 = vmatpush3.bf16.msra.mxu0 %v2960_v16 }
 0xa24   : > { %2255 = vmatprep.subr.bf16.mxu0 %v2579_v3 }
 0xa25   : > { %1588 = vadd.xlane.f32.xlu0 %v1587_v13 }
 0xa27   : > { %2256 = vmatpush3.bf16.msra.mxu0 %v2965_v19 }
 0xa28   : > { %2257 = vmatprep.subr.bf16.mxu0 %v2579_v3 }
 0xa2b   : > { %2258 = vmatpush3.bf16.msra.mxu0 %v2968_v21 }
 0xa2c   : > { %2259 = vmatprep.subr.bf16.mxu0 %v2579_v3 }
 0xa2f   : > { %2260 = vmatpush3.bf16.msra.mxu0 %v2973_v23 }
 0xa30   : > { %2261 = vmatprep.subr.bf16.mxu0 %v2579_v3 }
 0xa33   : > { %2262 = vmatpush3.bf16.msra.mxu0 %v2976_v25 }
 0xa34   : > { %2263 = vmatprep.subr.bf16.mxu0 %v2579_v3 }
 0xa37   : > { %2264 = vmatpush3.bf16.msra.mxu0 %v2982_v60 }
 0xa5f   : > { %v1643_v15 = vpop.f32.mrf.mxu0 }
 0xa61   : > { %v2229_v16 = vpop.f32.mrf.mxu0 }
 0xa63   : > { %v1646_v47 = vpop.f32.mrf.mxu0 }
 0xa65   : > { %v2230_v19 = vpop.f32.mrf.mxu0 }
 0xa9a   : > { %v1592_v44 = vpop.xlane.xlu0 %1591 }
 0xa9b   : > { %2414 = vrcp.f32 %v1592_v44 }
 0xaa2   : > { %v1595_v7 = vpop.xlane.xlu1 %1594 }
 0xaa3   : > { %2416 = vrcp.f32 %v1595_v7 }
 0xaa8   : > { %v2415_v21 = vpop.eup %2414 }
 0xaaa   : > { %v1598_v14 = vpop.xlane.xlu0 %1597 }
 0xaab   : > { %2418 = vrcp.f32 %v1598_v14 }
 0xaae   : > { %v1589_v56 = vpop.xlane.xlu0 %1588 }
 0xaaf   : > { %2420 = vrcp.f32 %v1589_v56 }
 0xab0   : > { %v2417_v27 = vpop.eup %2416 }
 0xab8   : > { %v2419_v51 = vpop.eup %2418 }
 0xabc   : > { %v2421_v1 = vpop.eup %2420 }
 0xabd   : > { %v1791_v5 = vmul.f32 %v2421_v1, %v1643_v15 }
 0xad2   : > { %v1689_v17 = vpop.f32.mrf.mxu1 }
 0xad3   : > { %v1792_v23 = vmul.f32 %v2415_v21, %v1689_v17 }
 0xad4   : > { %v2235_v24 = vpop.f32.mrf.mxu1 }
 0xad5   : > { %1796 = vrot.lane.b32.xlu1 %v1792_v23, %s2584_s18 }
 0xad6   : > { %v1692_v25 = vpop.f32.mrf.mxu1 }
 0xad8   : > { %v2236_v3 = vpop.f32.mrf.mxu1 }
 0xada   : > { %v1735_v60 = vpop.f32.mrf.mxu0 }
 0xadb   : > { %v1793_v48 = vmul.f32 %v2417_v27, %v1735_v60 }
 0xadc   : > { %v2241_v30 = vpop.f32.mrf.mxu0 }
 0xadd   : > { %1800 = vrot.lane.b32.xlu0 %v1793_v48, %s2582_s14  ;;  %s3128_s14 = scalar_lea.hbm %s3179_s8, %s2022_s20 }
 0xade   : > { %v1738_v49 = vpop.f32.mrf.mxu0 }
 0xae0   : > { %v2242_v50 = vpop.f32.mrf.mxu0 }
 0xae2   : > { %v1781_v52 = vpop.f32.mrf.mxu1 }
 0xae3   : > { %v1794_v53 = vmul.f32 %v2419_v51, %v1781_v52 }
 0xae4   : > { %v2247_v54 = vpop.f32.mrf.mxu1 }
 0xae5   : > { %1804 = vrot.lane.b32.xlu1 %v1794_v53, %s2583_s17  ;;  %s2585_s17 = smov [#allocation8]  }
 0xae6   : > { %v1784_v0 = vpop.f32.mrf.mxu1  ;;  %s2506_s18 = sshll.u32 %s2585_s17, 4  ;;  %s2507_s18 = int_to_ptr.vmem [resolvable:$false] %s2506_s18 }
 0xae7   : > { %s2508_s23 = scalar_lea.vmem %s2507_s18, 256  ;;  %p2509_p6 = scmp.lt.s32.totalorder %s3130_s13, %s2507_s18 }
 0xae8   : > { %v2248_v55 = vpop.f32.mrf.mxu1  ;;  %p2510_p12 = scmp.lt.s32.totalorder %s2508_s23, %s2502_s19 }
 0xaea   : > { %p2511_p3 = por %p2510_p12, %p2509_p6 }
 0xaec   : > { %p2512_p9 = pnand %p2511_p3, %p2505_p2 }
 0xb47   : > { %v1797_v2 = vpop.permute.xlu1 %1796 }
 0xb48   : > { %v1807_v18 = vsel %vm686_vm2, %v1791_v5, %v1797_v2 }
 0xb4f   : > { %v1801_v6 = vpop.permute.xlu0 %1800 }
 0xb50   : > { %v1808_v22 = vsel %vm1124_vm5, %v1807_v18, %v1801_v6 }
 0xb57   : > { %v1805_v26 = vpop.permute.xlu1 %1804 }
 0xb58   : > { %v1809_v28 = vsel %vm1126_vm6, %v1808_v22, %v1805_v26 }
 0xb59   : > { %v1810_v35 = vpack.c.bf16 %v1809_v28, %v1809_v28 }
 0xb5b   : > { %2266 = vmatmul.mubr.bf16.vlgmr.msra.gmra.mxu0 %v1810_v35 }
 0xc1b   : > { %v1845_v29 = vpop.f32.mrf.mxu0 }
 0xc1c   : > { %v1846_v57 = vadd.f32 %v3012_v4, %v1845_v29 }
 0xc1d   : > { %v2267_v58 = vpop.f32.mrf.mxu0 }
 0xc1e   : > { %v1851_v59 = vadd.f32 %v1846_v57, %v3016_v20 }
 0xc1f   : > { %v1848_v61 = vpop.f32.mrf.mxu0 }
 0xc20   : > { %1852 = vst [vmem:[%s349_s11] sm:$0xff] %v1851_v59 }
 0xc21   : > { %v2268_v62 = vpop.f32.mrf.mxu0 }
 0xc22   : > { %2515 = shalt.err (!%p2512_p9)
}
 0xc23   : > { %s2516_s24 = scalar_lea.hbm %s3128_s14, 128  ;;  %s2520_s26 = scalar_lea.hbm %s3179_s8, 256 }
 0xc24   : > { %p2517_p13 = scmp.ne.s32.totalorder %s3128_s14, %s2516_s24  ;;  %p2521_p4 = scmp.lt.s32.totalorder %s3128_s14, %s3179_s8 }
 0xc25   : > { %p2522_p8 = scmp.lt.s32.totalorder %s2520_s26, %s2516_s24 }
 0xc26   : > { %p2518_p5 = pnand %p2517_p13, %p3202_p0 }
 0xc27   : > { %p2523_p7 = por %p2522_p8, %p2521_p4 }
 0xc28   : > { %p2519_p10 = pneg %p2518_p5 }
 0xc2a   : > { %p2524_p11 = pnand %p2523_p7, %p2519_p10 }
 0xc2c   : > { %2527 = shalt.err (!%p2524_p11)
}
 0xc2d   : > { %2279 = dma.vmem_to_hbm [thread:$0]  (%p3202_p0), %s3130_s13, 128, %s3128_s14, %s1854_s9  }
 0xc2e PF: > { %s1879_s20 = sand.u32 1, %s2558_s27   ;;  %p3203_p1 = scmp.ne.s32.totalorder %s3187_s12, 0 }
 0xc2f   : > { %p3204_p2 = scmp.ge.s32.totalorder %s2570_s30, 2  ;;  %s1880_s11 = scalar_lea.sflag [#allocation4], %s1879_s20 }
 0xc31   : > { %p2293_p6 = pnand %p3204_p2, %p3203_p1 }
 0xc33   : > { %p2294_p12 = pneg %p2293_p6 }
 0xc35   : > { %2553 = dma.done.wait (%p2294_p12), %s1880_s11, 128  }
 0xc36   : > { %2555 = vsyncadd (%p2294_p12), %s1880_s11, 4294967168  ;;  %s3205_s25 = sld [smem:[#allocation12_spill]]  ;;  %p22_p3 = scmp.ge.s32.totalorder %s2703_s15, 4  }
 0xc37   : > { %s3206_s27 = smov %s2562_s28  ;;  %s3207_s28 = smov %s2566_s29 }
 0xc38   : > { %s3209_s30 = smov %s2703_s15  ;;  %24 = sbr.rel (!%p22_p3) target bundleno = 9 (0x9), region = 105 }
 0xc3c   : > { %s3208_s29 = smov %s3205_s25 }
 0xc3d   :  { %1885 = vsyncpa [#allocation3], 1 }
 0xc3e   :  { %1887 = vsyncpa [#allocation3 + $0x1], 1 }
 0xc3f   :  { %1888 = vsyncpa [#allocation6], 1 }
 0xc40   :  { %1889 = vsyncpa [#allocation4], 1 }
 0xc41   :  { %1891 = vsyncpa [#allocation4 + $0x1], 1 }

</bundles_post_ra>
